<compile_context>
chip_gen: v7x
topology: tpu7x:2x2x1
jax: 0.10.0
libtpu: 0.0.40
codegen_flags: <defaults>
</compile_context>

<pallas_src>
import functools
import math

import jax
import jax.numpy as jnp
from jax.experimental import pallas as pl
from jax.experimental.pallas import tpu as pltpu


_VMEM_LIMIT = 32 * 1024 * 1024  # explicit scoped-VMEM budget, safe on v5e/v6e/v7x


def _cparams(n_axes=1):
    return pltpu.CompilerParams(
        dimension_semantics=("parallel",) * n_axes,
        vmem_limit_bytes=_VMEM_LIMIT,
    )


def _row_tile(m, target=256):
    """Largest row tile <= target that divides m and is a multiple of 8."""
    for t in (target, 128, 64, 32, 16, 8):
        if t <= m and m % t == 0:
            return t
    return m  # tiny / odd M: single full block


# ----------------------------------------------------------------------------
# Fused Pallas kernels
# ----------------------------------------------------------------------------

def _matmul_bias_kernel(x_ref, w_ref, b_ref, o_ref, *, activation):
    acc = jnp.dot(x_ref[...], w_ref[...], preferred_element_type=jnp.float32)
    acc = acc + b_ref[...]
    if activation == "relu":
        acc = jnp.maximum(acc, 0.0)
    o_ref[...] = acc.astype(o_ref.dtype)


def row_matmul(x, w, b, *, activation="none", out_dtype=jnp.float32):
    """x:(M,K) @ w:(K,N) + b:(N,), row-tiled grid, bf16 MXU / f32 accumulate."""
    M, K = x.shape
    N = w.shape[1]
    tm = _row_tile(M)
    return pl.pallas_call(
        functools.partial(_matmul_bias_kernel, activation=activation),
        out_shape=jax.ShapeDtypeStruct((M, N), out_dtype),
        grid=(M // tm,),
        in_specs=[
            pl.BlockSpec((tm, K), lambda i: (i, 0)),
            pl.BlockSpec((K, N), lambda i: (0, 0)),
            pl.BlockSpec((1, N), lambda i: (0, 0)),
        ],
        out_specs=pl.BlockSpec((tm, N), lambda i: (i, 0)),
        compiler_params=_cparams(1),
    )(x.astype(jnp.bfloat16), w.astype(jnp.bfloat16),
      b.reshape(1, N).astype(jnp.float32))


def _attn_block_kernel(qkv_ref, x_ref, wo_ref, bo_ref, g_ref, bln_ref, o_ref,
                       *, n_head, d_model, scale, eps):
    """Per-batch fused: MHA (all heads) + output proj + residual + LayerNorm."""
    D = d_model
    dh = D // n_head
    qkv = qkv_ref[0]                                   # (T, 3D) bf16
    T = qkv.shape[0]
    acc = jnp.zeros((T, D), dtype=jnp.float32)
    for h in range(n_head):                            # static unroll over heads
        q_h = qkv[:, h * dh:(h + 1) * dh]
        k_h = qkv[:, D + h * dh:D + (h + 1) * dh]
        v_h = qkv[:, 2 * D + h * dh:2 * D + (h + 1) * dh]
        s = jnp.dot(q_h, k_h.T, preferred_element_type=jnp.float32) * scale
        m = jnp.max(s, axis=-1, keepdims=True)
        p = jnp.exp(s - m)
        p = p * pl.reciprocal(jnp.sum(p, axis=-1, keepdims=True), approx=True)
        ctx_h = jnp.dot(p.astype(jnp.bfloat16), v_h,
                        preferred_element_type=jnp.float32)     # (T, dh) f32
        # concat(ctx_heads) @ Wo  ==  sum_h  ctx_h @ Wo[h*dh:(h+1)*dh, :]
        acc = acc + jnp.dot(ctx_h.astype(jnp.bfloat16),
                            wo_ref[h * dh:(h + 1) * dh, :],
                            preferred_element_type=jnp.float32)
    y = acc + bo_ref[...] + x_ref[0]                   # bias + residual (f32)
    mean = jnp.mean(y, axis=-1, keepdims=True)
    c = y - mean
    var = jnp.mean(c * c, axis=-1, keepdims=True)
    o_ref[0] = c * jax.lax.rsqrt(var + eps) * g_ref[...] + bln_ref[...]


def attn_block(qkv, x, wo, bo, ln_g, ln_b, *, n_head, eps=1e-5):
    """qkv:(B,T,3D) bf16, x:(B,T,D) f32 residual -> LayerNorm(x + MHA(x))."""
    B, T, threeD = qkv.shape
    D = threeD // 3
    dh = D // n_head
    kernel = functools.partial(_attn_block_kernel, n_head=n_head, d_model=D,
                               scale=1.0 / math.sqrt(dh), eps=eps)
    return pl.pallas_call(
        kernel,
        out_shape=jax.ShapeDtypeStruct((B, T, D), jnp.float32),
        grid=(B,),
        in_specs=[
            pl.BlockSpec((1, T, threeD), lambda b: (b, 0, 0)),
            pl.BlockSpec((1, T, D), lambda b: (b, 0, 0)),
            pl.BlockSpec((D, D), lambda b: (0, 0)),
            pl.BlockSpec((1, D), lambda b: (0, 0)),
            pl.BlockSpec((1, D), lambda b: (0, 0)),
            pl.BlockSpec((1, D), lambda b: (0, 0)),
        ],
        out_specs=pl.BlockSpec((1, T, D), lambda b: (b, 0, 0)),
        compiler_params=_cparams(1),
    )(qkv.astype(jnp.bfloat16), x.astype(jnp.float32),
      wo.astype(jnp.bfloat16), bo.reshape(1, D).astype(jnp.float32),
      ln_g.reshape(1, D).astype(jnp.float32),
      ln_b.reshape(1, D).astype(jnp.float32))


def _ffn_ln_kernel(x_ref, w1_ref, b1_ref, w2_ref, b2_ref, g_ref, bln_ref,
                   o_ref, *, eps):
    x = x_ref[...]                                     # (tm, D) f32 (residual)
    h = jnp.dot(x.astype(jnp.bfloat16), w1_ref[...],
                preferred_element_type=jnp.float32) + b1_ref[...]
    h = jnp.maximum(h, 0.0)
    y = jnp.dot(h.astype(jnp.bfloat16), w2_ref[...],
                preferred_element_type=jnp.float32) + b2_ref[...]
    y = y + x
    mean = jnp.mean(y, axis=-1, keepdims=True)
    c = y - mean
    var = jnp.mean(c * c, axis=-1, keepdims=True)
    o_ref[...] = c * jax.lax.rsqrt(var + eps) * g_ref[...] + bln_ref[...]


def ffn_block(x, w1, b1, w2, b2, ln_g, ln_b, eps=1e-5):
    """LayerNorm(x + relu(x@W1+b1)@W2+b2) over row tiles. x:(M,D) f32."""
    M, D = x.shape
    F = w1.shape[1]
    tm = _row_tile(M)
    return pl.pallas_call(
        functools.partial(_ffn_ln_kernel, eps=eps),
        out_shape=jax.ShapeDtypeStruct((M, D), jnp.float32),
        grid=(M // tm,),
        in_specs=[
            pl.BlockSpec((tm, D), lambda i: (i, 0)),
            pl.BlockSpec((D, F), lambda i: (0, 0)),
            pl.BlockSpec((1, F), lambda i: (0, 0)),
            pl.BlockSpec((F, D), lambda i: (0, 0)),
            pl.BlockSpec((1, D), lambda i: (0, 0)),
            pl.BlockSpec((1, D), lambda i: (0, 0)),
            pl.BlockSpec((1, D), lambda i: (0, 0)),
        ],
        out_specs=pl.BlockSpec((tm, D), lambda i: (i, 0)),
        compiler_params=_cparams(1),
    )(x.astype(jnp.float32),
      w1.astype(jnp.bfloat16), b1.reshape(1, F).astype(jnp.float32),
      w2.astype(jnp.bfloat16), b2.reshape(1, D).astype(jnp.float32),
      ln_g.reshape(1, D).astype(jnp.float32),
      ln_b.reshape(1, D).astype(jnp.float32))


def _cls_logsoftmax_kernel(x_ref, w_ref, b_ref, o_ref):
    logits = jnp.dot(x_ref[...], w_ref[...],
                     preferred_element_type=jnp.float32) + b_ref[...]
    m = jnp.max(logits, axis=-1, keepdims=True)
    s = jnp.sum(jnp.exp(logits - m), axis=-1, keepdims=True)
    o_ref[...] = logits - m - jnp.log(s)


def classifier_logsoftmax(x, w, b):
    """log_softmax(x @ w + b) fused; full vocab row kept in the output tile."""
    M, D = x.shape
    V = w.shape[1]
    tm = _row_tile(M)
    return pl.pallas_call(
        _cls_logsoftmax_kernel,
        out_shape=jax.ShapeDtypeStruct((M, V), jnp.float32),
        grid=(M // tm,),
        in_specs=[
            pl.BlockSpec((tm, D), lambda i: (i, 0)),
            pl.BlockSpec((D, V), lambda i: (0, 0)),
            pl.BlockSpec((1, V), lambda i: (0, 0)),
        ],
        out_specs=pl.BlockSpec((tm, V), lambda i: (i, 0)),
        compiler_params=_cparams(1),
    )(x.astype(jnp.bfloat16), w.astype(jnp.bfloat16),
      b.reshape(1, V).astype(jnp.float32))


def _conv_kernel(p_ref, w_ref, b_ref, o_ref):
    o_ref[0] = jnp.dot(p_ref[0], w_ref[...],
                       preferred_element_type=jnp.float32) + b_ref[...]


def _conv_pe_kernel(p_ref, w_ref, b_ref, pe_ref, o_ref):
    acc = jnp.dot(p_ref[0], w_ref[...],
                  preferred_element_type=jnp.float32) + b_ref[...]
    o_ref[0] = acc + pe_ref[...]


def conv1d_k3_s2(x_btc, w, b, pe=None):
    """nn.Conv1d(Cin,Cout,3,stride=2,padding=0), time-major input (B,T,Cin).
    Optional fused positional-encoding add on the output."""
    B, T, Cin = x_btc.shape
    Cout = w.shape[0]
    Tout = (T - 3) // 2 + 1
    # TODO(synk): im2col still materializes JAX-side; for long T fold the
    # stride-2 window gather into the BlockSpec index_map instead.
    patches = jnp.stack([x_btc[:, k:k + 2 * Tout:2, :] for k in range(3)],
                        axis=-1)                       # (B, Tout, Cin, 3)
    patches = patches.reshape(B, Tout, Cin * 3).astype(jnp.bfloat16)
    w2 = jnp.transpose(w.reshape(Cout, Cin * 3)).astype(jnp.bfloat16)

    args = [patches, w2, b.reshape(1, Cout).astype(jnp.float32)]
    in_specs = [
        pl.BlockSpec((1, Tout, Cin * 3), lambda i: (i, 0, 0)),
        pl.BlockSpec((Cin * 3, Cout), lambda i: (0, 0)),
        pl.BlockSpec((1, Cout), lambda i: (0, 0)),
    ]
    if pe is None:
        kernel = _conv_kernel
    else:
        kernel = _conv_pe_kernel
        args.append(pe[:Tout].astype(jnp.float32))
        in_specs.append(pl.BlockSpec((Tout, Cout), lambda i: (0, 0)))

    return pl.pallas_call(
        kernel,
        out_shape=jax.ShapeDtypeStruct((B, Tout, Cout), jnp.float32),
        grid=(B,),
        in_specs=in_specs,
        out_specs=pl.BlockSpec((1, Tout, Cout), lambda i: (i, 0, 0)),
        compiler_params=_cparams(1),
    )(*args)


# ----------------------------------------------------------------------------
# Model glue
# ----------------------------------------------------------------------------

def sinusoidal_pe(max_len, d_model):
    pos = jnp.arange(max_len, dtype=jnp.float32)[:, None]
    i = jnp.arange(0, d_model, 2, dtype=jnp.float32)[None, :]
    div = jnp.exp(-i * (math.log(10000.0) / d_model))
    pe = jnp.zeros((max_len, d_model), dtype=jnp.float32)
    pe = pe.at[:, 0::2].set(jnp.sin(pos * div))
    pe = pe.at[:, 1::2].set(jnp.cos(pos * div))
    return pe


def encoder_layer(x, p, n_head):
    """Post-LN transformer encoder layer, 3 fused pallas_calls total."""
    B, T, D = x.shape
    x2 = x.reshape(B * T, D)
    qkv = row_matmul(x2, p["wqkv"], p["bqkv"], out_dtype=jnp.bfloat16)
    x_ln1 = attn_block(qkv.reshape(B, T, 3 * D), x, p["wo"], p["bo"],
                       p["ln1_g"], p["ln1_b"], n_head=n_head)
    out = ffn_block(x_ln1.reshape(B * T, D), p["w1"], p["b1"], p["w2"],
                    p["b2"], p["ln2_g"], p["ln2_b"])
    return out.reshape(B, T, D)


def early_encoder_forward(src, params, *, n_head):
    """src: (B, features_length, T) -> (n_enc_exits, B, T'', dec_voc_size)."""
    x = src.transpose(0, 2, 1)                          # (B, T, Cin)
    x = conv1d_k3_s2(x, params["conv1_w"], params["conv1_b"])
    # second conv has the positional encoding fused into its epilogue
    x = conv1d_k3_s2(x, params["conv2_w"], params["conv2_b"], pe=params["pe"])
    B, T2, D = x.shape

    # TODO(synk): no src_pad_mask support (reference passes None).
    enc = x
    outs = []
    for lin_p, enc_p in zip(params["linears"], params["encoders"]):
        for layer_p in enc_p:
            enc = encoder_layer(enc, layer_p, n_head)
        lp = classifier_logsoftmax(enc.reshape(B * T2, D),
                                   lin_p["w"], lin_p["b"])
        outs.append(lp.reshape(B, T2, -1))
    return jnp.stack(outs, axis=0)


# ----------------------------------------------------------------------------
# Deterministic parameter initialization (MXU weights stored in bf16)
# ----------------------------------------------------------------------------

def init_params(key, *, features_length, d_model, n_head, max_len,
                d_feed_forward, n_enc_layers, n_enc_exits, dec_voc_size):
    def normal(k, shape, scale=0.02, dtype=jnp.float32):
        return (scale * jax.random.normal(k, shape, dtype=jnp.float32)).astype(dtype)

    keys = iter(jax.random.split(key, 4096))
    params = {
        "conv1_w": normal(next(keys), (d_model, features_length, 3)),
        "conv1_b": jnp.zeros((d_model,), jnp.float32),
        "conv2_w": normal(next(keys), (d_model, d_model, 3)),
        "conv2_b": jnp.zeros((d_model,), jnp.float32),
        "pe": sinusoidal_pe(max_len, d_model),
        "linears": [],
        "encoders": [],
    }
    for _ in range(n_enc_exits):
        params["linears"].append({
            "w": normal(next(keys), (d_model, dec_voc_size), dtype=jnp.bfloat16),
            "b": jnp.zeros((dec_voc_size,), jnp.float32),
        })
        layers = []
        for _ in range(n_enc_layers):
            layers.append({
                # fused QKV projection weights: (D, 3D)
                "wqkv": normal(next(keys), (d_model, 3 * d_model), dtype=jnp.bfloat16),
                "bqkv": jnp.zeros((3 * d_model,), jnp.float32),
                "wo": normal(next(keys), (d_model, d_model), dtype=jnp.bfloat16),
                "bo": jnp.zeros((d_model,), jnp.float32),
                "ln1_g": jnp.ones((d_model,), jnp.float32),
                "ln1_b": jnp.zeros((d_model,), jnp.float32),
                "w1": normal(next(keys), (d_model, d_feed_forward), dtype=jnp.bfloat16),
                "b1": jnp.zeros((d_feed_forward,), jnp.float32),
                "w2": normal(next(keys), (d_feed_forward, d_model), dtype=jnp.bfloat16),
                "b2": jnp.zeros((d_model,), jnp.float32),
                "ln2_g": jnp.ones((d_model,), jnp.float32),
                "ln2_b": jnp.zeros((d_model,), jnp.float32),
            })
        params["encoders"].append(layers)
    return params


# ----------------------------------------------------------------------------
# Main
# ----------------------------------------------------------------------------

if __name__ == "__main__":
    # Small, conv-consistent shapes: T=35 -> conv1 -> 17 -> conv2 -> 8.
    B = 2
    features_length = 8
    T = 35
    d_model = 32
    n_head = 4
    max_len = 64
    d_feed_forward = 64
    n_enc_layers = 1
    n_enc_exits = 2
    dec_voc_size = 16

    key = jax.random.PRNGKey(0)
    k_in, k_par = jax.random.split(key)
    src = jax.random.normal(k_in, (B, features_length, T), dtype=jnp.float32)

    params = init_params(
        k_par,
        features_length=features_length, d_model=d_model, n_head=n_head,
        max_len=max_len, d_feed_forward=d_feed_forward,
        n_enc_layers=n_enc_layers, n_enc_exits=n_enc_exits,
        dec_voc_size=dec_voc_size,
    )

    fwd = jax.jit(functools.partial(early_encoder_forward, n_head=n_head))
    out = fwd(src, params)
    out = jax.block_until_ready(out)

    expected_T2 = ((T - 3) // 2 + 1 - 3) // 2 + 1
    assert out.shape == (n_enc_exits, B, expected_T2, dec_voc_size), out.shape
    # log_softmax rows must sum to ~1 in prob space
    assert jnp.allclose(jnp.sum(jnp.exp(out), axis=-1), 1.0, atol=1e-4)
    assert bool(jnp.all(jnp.isfinite(out)))
    print("KERNEL_OK")
</pallas_src>

<mosaic_0001>
module attributes {stable_mosaic.version = 11 : i64} {
  func.func @_conv_kernel(%arg0: i32, %arg1: memref<1x17x24xbf16, #tpu.memory_space<vmem>>, %arg2: memref<24x32xbf16, #tpu.memory_space<vmem>>, %arg3: memref<1x32xf32, #tpu.memory_space<vmem>>, %arg4: memref<1x17x32xf32, #tpu.memory_space<vmem>>) attributes {dimension_semantics = [#tpu.dimension_semantics<parallel>], iteration_bounds = array<i64: 2>, scalar_prefetch = 0 : i64, scratch_operands = 0 : i64, tpu.core_type = #tpu.core_type<tc>, window_params = [{transform_indices = @transform_0, window_bounds = array<i64: 1, 17, 24>}, {pipeline_mode = #tpu.pipeline_mode<synchronous>, transform_indices = @transform_1, window_bounds = array<i64: 24, 32>}, {pipeline_mode = #tpu.pipeline_mode<synchronous>, transform_indices = @transform_2, window_bounds = array<i64: 1, 32>}, {transform_indices = @transform_3, window_bounds = array<i64: 1, 17, 32>}]} {
    %c0 = arith.constant 0 : index
    %c0_0 = arith.constant 0 : index
    %c0_1 = arith.constant 0 : index
    %0 = vector.load %arg1[%c0, %c0_0, %c0_1] : memref<1x17x24xbf16, #tpu.memory_space<vmem>>, vector<1x17x24xbf16>
    %1 = vector.shape_cast %0 : vector<1x17x24xbf16> to vector<17x24xbf16>
    %c0_2 = arith.constant 0 : index
    %c0_3 = arith.constant 0 : index
    %2 = vector.load %arg2[%c0_2, %c0_3] : memref<24x32xbf16, #tpu.memory_space<vmem>>, vector<24x32xbf16>
    %cst = arith.constant dense<0.000000e+00> : vector<17x32xf32>
    %3 = tpu.matmul %1, %2, %cst {dimension_numbers = #tpu.dot_dimension_numbers<[1], [0], [0], [1], [0, 0, 1, 1], [], []>} : vector<17x24xbf16>, vector<24x32xbf16>, vector<17x32xf32> -> vector<17x32xf32>
    %c0_4 = arith.constant 0 : index
    %c0_5 = arith.constant 0 : index
    %4 = vector.load %arg3[%c0_4, %c0_5] : memref<1x32xf32, #tpu.memory_space<vmem>>, vector<1x32xf32>
    %5 = vector.broadcast %4 : vector<1x32xf32> to vector<17x32xf32>
    %6 = arith.addf %3, %5 : vector<17x32xf32>
    %c0_6 = arith.constant 0 : index
    %c0_7 = arith.constant 0 : index
    %c0_8 = arith.constant 0 : index
    %7 = vector.load %arg4[%c0_6, %c0_7, %c0_8] : memref<1x17x32xf32, #tpu.memory_space<vmem>>, vector<1x17x32xf32>
    %8 = vector.shape_cast %7 : vector<1x17x32xf32> to vector<17x32xf32>
    %9 = vector.shape_cast %6 : vector<17x32xf32> to vector<1x17x32xf32>
    tpu.vector_store %arg4[%c0_6, %c0_7, %c0_8], %9 {strides = array<i32>} : memref<1x17x32xf32, #tpu.memory_space<vmem>>, vector<1x17x32xf32>,
    return
  }
  func.func @transform_0(%arg0: i32) -> (i32, i32, i32) {
    %c0_i32 = arith.constant 0 : i32
    %c0_i32_0 = arith.constant 0 : i32
    %c0_i32_1 = arith.constant 0 : i32
    return %arg0, %c0_i32, %c0_i32_0 : i32, i32, i32
  }
  func.func @transform_1(%arg0: i32) -> (i32, i32) {
    %c0_i32 = arith.constant 0 : i32
    %c0_i32_0 = arith.constant 0 : i32
    %c0_i32_1 = arith.constant 0 : i32
    return %c0_i32, %c0_i32_0 : i32, i32
  }
  func.func @transform_2(%arg0: i32) -> (i32, i32) {
    %c0_i32 = arith.constant 0 : i32
    %c0_i32_0 = arith.constant 0 : i32
    %c0_i32_1 = arith.constant 0 : i32
    return %c0_i32, %c0_i32_0 : i32, i32
  }
  func.func @transform_3(%arg0: i32) -> (i32, i32, i32) {
    %c0_i32 = arith.constant 0 : i32
    %c0_i32_0 = arith.constant 0 : i32
    %c0_i32_1 = arith.constant 0 : i32
    return %arg0, %c0_i32, %c0_i32_0 : i32, i32, i32
  }
}

module attributes {stable_mosaic.version = 11 : i64} {
  func.func @_conv_pe_kernel(%arg0: i32, %arg1: memref<1x8x96xbf16, #tpu.memory_space<vmem>>, %arg2: memref<96x32xbf16, #tpu.memory_space<vmem>>, %arg3: memref<1x32xf32, #tpu.memory_space<vmem>>, %arg4: memref<8x32xf32, #tpu.memory_space<vmem>>, %arg5: memref<1x8x32xf32, #tpu.memory_space<vmem>>) attributes {dimension_semantics = [#tpu.dimension_semantics<parallel>], iteration_bounds = array<i64: 2>, scalar_prefetch = 0 : i64, scratch_operands = 0 : i64, tpu.core_type = #tpu.core_type<tc>, window_params = [{transform_indices = @transform_0, window_bounds = array<i64: 1, 8, 96>}, {pipeline_mode = #tpu.pipeline_mode<synchronous>, transform_indices = @transform_1, window_bounds = array<i64: 96, 32>}, {pipeline_mode = #tpu.pipeline_mode<synchronous>, transform_indices = @transform_2, window_bounds = array<i64: 1, 32>}, {pipeline_mode = #tpu.pipeline_mode<synchronous>, transform_indices = @transform_3, window_bounds = array<i64: 8, 32>}, {transform_indices = @transform_4, window_bounds = array<i64: 1, 8, 32>}]} {
    %c0 = arith.constant 0 : index
    %c0_0 = arith.constant 0 : index
    %c0_1 = arith.constant 0 : index
    %0 = vector.load %arg1[%c0, %c0_0, %c0_1] : memref<1x8x96xbf16, #tpu.memory_space<vmem>>, vector<1x8x96xbf16>
    %1 = vector.shape_cast %0 : vector<1x8x96xbf16> to vector<8x96xbf16>
    %c0_2 = arith.constant 0 : index
    %c0_3 = arith.constant 0 : index
    %2 = vector.load %arg2[%c0_2, %c0_3] : memref<96x32xbf16, #tpu.memory_space<vmem>>, vector<96x32xbf16>
    %cst = arith.constant dense<0.000000e+00> : vector<8x32xf32>
    %3 = tpu.matmul %1, %2, %cst {dimension_numbers = #tpu.dot_dimension_numbers<[1], [0], [0], [1], [0, 0, 1, 1], [], []>} : vector<8x96xbf16>, vector<96x32xbf16>, vector<8x32xf32> -> vector<8x32xf32>
    %c0_4 = arith.constant 0 : index
    %c0_5 = arith.constant 0 : index
    %4 = vector.load %arg3[%c0_4, %c0_5] : memref<1x32xf32, #tpu.memory_space<vmem>>, vector<1x32xf32>
    %5 = vector.broadcast %4 : vector<1x32xf32> to vector<8x32xf32>
    %6 = arith.addf %3, %5 : vector<8x32xf32>
    %c0_6 = arith.constant 0 : index
    %c0_7 = arith.constant 0 : index
    %7 = vector.load %arg4[%c0_6, %c0_7] : memref<8x32xf32, #tpu.memory_space<vmem>>, vector<8x32xf32>
    %8 = arith.addf %6, %7 : vector<8x32xf32>
    %c0_8 = arith.constant 0 : index
    %c0_9 = arith.constant 0 : index
    %c0_10 = arith.constant 0 : index
    %9 = vector.load %arg5[%c0_8, %c0_9, %c0_10] : memref<1x8x32xf32, #tpu.memory_space<vmem>>, vector<1x8x32xf32>
    %10 = vector.shape_cast %9 : vector<1x8x32xf32> to vector<8x32xf32>
    %11 = vector.shape_cast %8 : vector<8x32xf32> to vector<1x8x32xf32>
    tpu.vector_store %arg5[%c0_8, %c0_9, %c0_10], %11 {strides = array<i32>} : memref<1x8x32xf32, #tpu.memory_space<vmem>>, vector<1x8x32xf32>,
    return
  }
  func.func @transform_0(%arg0: i32) -> (i32, i32, i32) {
    %c0_i32 = arith.constant 0 : i32
    %c0_i32_0 = arith.constant 0 : i32
    %c0_i32_1 = arith.constant 0 : i32
    return %arg0, %c0_i32, %c0_i32_0 : i32, i32, i32
  }
  func.func @transform_1(%arg0: i32) -> (i32, i32) {
    %c0_i32 = arith.constant 0 : i32
    %c0_i32_0 = arith.constant 0 : i32
    %c0_i32_1 = arith.constant 0 : i32
    return %c0_i32, %c0_i32_0 : i32, i32
  }
  func.func @transform_2(%arg0: i32) -> (i32, i32) {
    %c0_i32 = arith.constant 0 : i32
    %c0_i32_0 = arith.constant 0 : i32
    %c0_i32_1 = arith.constant 0 : i32
    return %c0_i32, %c0_i32_0 : i32, i32
  }
  func.func @transform_3(%arg0: i32) -> (i32, i32) {
    %c0_i32 = arith.constant 0 : i32
    %c0_i32_0 = arith.constant 0 : i32
    %c0_i32_1 = arith.constant 0 : i32
    return %c0_i32, %c0_i32_0 : i32, i32
  }
  func.func @transform_4(%arg0: i32) -> (i32, i32, i32) {
    %c0_i32 = arith.constant 0 : i32
    %c0_i32_0 = arith.constant 0 : i32
    %c0_i32_1 = arith.constant 0 : i32
    return %arg0, %c0_i32, %c0_i32_0 : i32, i32, i32
  }
}

module attributes {stable_mosaic.version = 11 : i64} {
  func.func @_matmul_bias_kernel(%arg0: i32, %arg1: memref<16x32xbf16, #tpu.memory_space<vmem>>, %arg2: memref<32x96xbf16, #tpu.memory_space<vmem>>, %arg3: memref<1x96xf32, #tpu.memory_space<vmem>>, %arg4: memref<16x96xbf16, #tpu.memory_space<vmem>>) attributes {dimension_semantics = [#tpu.dimension_semantics<parallel>], iteration_bounds = array<i64: 1>, scalar_prefetch = 0 : i64, scratch_operands = 0 : i64, tpu.core_type = #tpu.core_type<tc>, window_params = [{transform_indices = @transform_0, window_bounds = array<i64: 16, 32>}, {pipeline_mode = #tpu.pipeline_mode<synchronous>, transform_indices = @transform_1, window_bounds = array<i64: 32, 96>}, {pipeline_mode = #tpu.pipeline_mode<synchronous>, transform_indices = @transform_2, window_bounds = array<i64: 1, 96>}, {transform_indices = @transform_3, window_bounds = array<i64: 16, 96>}]} {
    %c0 = arith.constant 0 : index
    %c0_0 = arith.constant 0 : index
    %0 = vector.load %arg1[%c0, %c0_0] : memref<16x32xbf16, #tpu.memory_space<vmem>>, vector<16x32xbf16>
    %c0_1 = arith.constant 0 : index
    %c0_2 = arith.constant 0 : index
    %1 = vector.load %arg2[%c0_1, %c0_2] : memref<32x96xbf16, #tpu.memory_space<vmem>>, vector<32x96xbf16>
    %cst = arith.constant dense<0.000000e+00> : vector<16x96xf32>
    %2 = tpu.matmul %0, %1, %cst {dimension_numbers = #tpu.dot_dimension_numbers<[1], [0], [0], [1], [0, 0, 1, 1], [], []>} : vector<16x32xbf16>, vector<32x96xbf16>, vector<16x96xf32> -> vector<16x96xf32>
    %c0_3 = arith.constant 0 : index
    %c0_4 = arith.constant 0 : index
    %3 = vector.load %arg3[%c0_3, %c0_4] : memref<1x96xf32, #tpu.memory_space<vmem>>, vector<1x96xf32>
    %4 = vector.broadcast %3 : vector<1x96xf32> to vector<16x96xf32>
    %5 = arith.addf %2, %4 : vector<16x96xf32>
    %6 = arith.truncf %5 : vector<16x96xf32> to vector<16x96xbf16>
    %c0_5 = arith.constant 0 : index
    %c0_6 = arith.constant 0 : index
    %7 = vector.load %arg4[%c0_5, %c0_6] : memref<16x96xbf16, #tpu.memory_space<vmem>>, vector<16x96xbf16>
    tpu.vector_store %arg4[%c0_5, %c0_6], %6 {strides = array<i32>} : memref<16x96xbf16, #tpu.memory_space<vmem>>, vector<16x96xbf16>,
    return
  }
  func.func @transform_0(%arg0: i32) -> (i32, i32) {
    %c0_i32 = arith.constant 0 : i32
    %c0_i32_0 = arith.constant 0 : i32
    return %arg0, %c0_i32 : i32, i32
  }
  func.func @transform_1(%arg0: i32) -> (i32, i32) {
    %c0_i32 = arith.constant 0 : i32
    %c0_i32_0 = arith.constant 0 : i32
    %c0_i32_1 = arith.constant 0 : i32
    return %c0_i32, %c0_i32_0 : i32, i32
  }
  func.func @transform_2(%arg0: i32) -> (i32, i32) {
    %c0_i32 = arith.constant 0 : i32
    %c0_i32_0 = arith.constant 0 : i32
    %c0_i32_1 = arith.constant 0 : i32
    return %c0_i32, %c0_i32_0 : i32, i32
  }
  func.func @transform_3(%arg0: i32) -> (i32, i32) {
    %c0_i32 = arith.constant 0 : i32
    %c0_i32_0 = arith.constant 0 : i32
    return %arg0, %c0_i32 : i32, i32
  }
}

module attributes {stable_mosaic.version = 11 : i64} {
  func.func @_attn_block_kernel(%arg0: i32, %arg1: memref<1x8x96xbf16, #tpu.memory_space<vmem>>, %arg2: memref<1x8x32xf32, #tpu.memory_space<vmem>>, %arg3: memref<32x32xbf16, #tpu.memory_space<vmem>>, %arg4: memref<1x32xf32, #tpu.memory_space<vmem>>, %arg5: memref<1x32xf32, #tpu.memory_space<vmem>>, %arg6: memref<1x32xf32, #tpu.memory_space<vmem>>, %arg7: memref<1x8x32xf32, #tpu.memory_space<vmem>>) attributes {dimension_semantics = [#tpu.dimension_semantics<parallel>], iteration_bounds = array<i64: 2>, scalar_prefetch = 0 : i64, scratch_operands = 0 : i64, tpu.core_type = #tpu.core_type<tc>, window_params = [{transform_indices = @transform_0, window_bounds = array<i64: 1, 8, 96>}, {transform_indices = @transform_1, window_bounds = array<i64: 1, 8, 32>}, {pipeline_mode = #tpu.pipeline_mode<synchronous>, transform_indices = @transform_2, window_bounds = array<i64: 32, 32>}, {pipeline_mode = #tpu.pipeline_mode<synchronous>, transform_indices = @transform_3, window_bounds = array<i64: 1, 32>}, {pipeline_mode = #tpu.pipeline_mode<synchronous>, transform_indices = @transform_4, window_bounds = array<i64: 1, 32>}, {pipeline_mode = #tpu.pipeline_mode<synchronous>, transform_indices = @transform_5, window_bounds = array<i64: 1, 32>}, {transform_indices = @transform_6, window_bounds = array<i64: 1, 8, 32>}]} {
    %c0 = arith.constant 0 : index
    %c0_0 = arith.constant 0 : index
    %c0_1 = arith.constant 0 : index
    %0 = vector.load %arg1[%c0, %c0_0, %c0_1] : memref<1x8x96xbf16, #tpu.memory_space<vmem>>, vector<1x8x96xbf16>
    %1 = vector.shape_cast %0 : vector<1x8x96xbf16> to vector<8x96xbf16>
    %cst = arith.constant 0.000000e+00 : f32
    %2 = vector.broadcast %cst : f32 to vector<8x32xf32>
    %3 = vector.extract_strided_slice %1 {offsets = [0, 0], sizes = [8, 8], strides = [1, 1]} : vector<8x96xbf16> to vector<8x8xbf16>
    %4 = vector.extract_strided_slice %1 {offsets = [0, 32], sizes = [8, 8], strides = [1, 1]} : vector<8x96xbf16> to vector<8x8xbf16>
    %5 = vector.extract_strided_slice %1 {offsets = [0, 64], sizes = [8, 8], strides = [1, 1]} : vector<8x96xbf16> to vector<8x8xbf16>
    %6 = tpu.transpose %4, [1, 0] : vector<8x8xbf16> -> vector<8x8xbf16>
    %cst_2 = arith.constant dense<0.000000e+00> : vector<8x8xf32>
    %7 = tpu.matmul %3, %6, %cst_2 {dimension_numbers = #tpu.dot_dimension_numbers<[1], [0], [0], [1], [0, 0, 1, 1], [], []>} : vector<8x8xbf16>, vector<8x8xbf16>, vector<8x8xf32> -> vector<8x8xf32>
    %cst_3 = arith.constant 0.353553385 : f32
    %8 = vector.broadcast %cst_3 : f32 to vector<8x8xf32>
    %9 = arith.mulf %7, %8 : vector<8x8xf32>
    %cst_4 = arith.constant dense<0xFF800000> : vector<8xf32>
    %10 = vector.multi_reduction <maximumf>, %9, %cst_4 [1] : vector<8x8xf32> to vector<8xf32>
    %11 = vector.shape_cast %10 : vector<8xf32> to vector<8x1xf32>
    %12 = vector.broadcast %11 : vector<8x1xf32> to vector<8x8xf32>
    %13 = arith.subf %9, %12 : vector<8x8xf32>
    %14 = math.exp %13 : vector<8x8xf32>
    %cst_5 = arith.constant dense<0.000000e+00> : vector<8xf32>
    %15 = vector.multi_reduction <add>, %14, %cst_5 [1] : vector<8x8xf32> to vector<8xf32>
    %16 = vector.shape_cast %15 : vector<8xf32> to vector<8x1xf32>
    %17 = tpu.reciprocal %16 {approx = true} : vector<8x1xf32> -> vector<8x1xf32>
    %18 = vector.broadcast %17 : vector<8x1xf32> to vector<8x8xf32>
    %19 = arith.mulf %14, %18 : vector<8x8xf32>
    %20 = arith.truncf %19 : vector<8x8xf32> to vector<8x8xbf16>
    %cst_6 = arith.constant dense<0.000000e+00> : vector<8x8xf32>
    %21 = tpu.matmul %20, %5, %cst_6 {dimension_numbers = #tpu.dot_dimension_numbers<[1], [0], [0], [1], [0, 0, 1, 1], [], []>} : vector<8x8xbf16>, vector<8x8xbf16>, vector<8x8xf32> -> vector<8x8xf32>
    %22 = arith.truncf %21 : vector<8x8xf32> to vector<8x8xbf16>
    %c0_7 = arith.constant 0 : index
    %c0_8 = arith.constant 0 : index
    %23 = vector.load %arg3[%c0_7, %c0_8] : memref<32x32xbf16, #tpu.memory_space<vmem>>, vector<8x32xbf16>
    %cst_9 = arith.constant dense<0.000000e+00> : vector<8x32xf32>
    %24 = tpu.matmul %22, %23, %cst_9 {dimension_numbers = #tpu.dot_dimension_numbers<[1], [0], [0], [1], [0, 0, 1, 1], [], []>} : vector<8x8xbf16>, vector<8x32xbf16>, vector<8x32xf32> -> vector<8x32xf32>
    %25 = arith.addf %2, %24 : vector<8x32xf32>
    %26 = vector.extract_strided_slice %1 {offsets = [0, 8], sizes = [8, 8], strides = [1, 1]} : vector<8x96xbf16> to vector<8x8xbf16>
    %27 = vector.extract_strided_slice %1 {offsets = [0, 40], sizes = [8, 8], strides = [1, 1]} : vector<8x96xbf16> to vector<8x8xbf16>
    %28 = vector.extract_strided_slice %1 {offsets = [0, 72], sizes = [8, 8], strides = [1, 1]} : vector<8x96xbf16> to vector<8x8xbf16>
    %29 = tpu.transpose %27, [1, 0] : vector<8x8xbf16> -> vector<8x8xbf16>
    %cst_10 = arith.constant dense<0.000000e+00> : vector<8x8xf32>
    %30 = tpu.matmul %26, %29, %cst_10 {dimension_numbers = #tpu.dot_dimension_numbers<[1], [0], [0], [1], [0, 0, 1, 1], [], []>} : vector<8x8xbf16>, vector<8x8xbf16>, vector<8x8xf32> -> vector<8x8xf32>
    %cst_11 = arith.constant 0.353553385 : f32
    %31 = vector.broadcast %cst_11 : f32 to vector<8x8xf32>
    %32 = arith.mulf %30, %31 : vector<8x8xf32>
    %cst_12 = arith.constant dense<0xFF800000> : vector<8xf32>
    %33 = vector.multi_reduction <maximumf>, %32, %cst_12 [1] : vector<8x8xf32> to vector<8xf32>
    %34 = vector.shape_cast %33 : vector<8xf32> to vector<8x1xf32>
    %35 = vector.broadcast %34 : vector<8x1xf32> to vector<8x8xf32>
    %36 = arith.subf %32, %35 : vector<8x8xf32>
    %37 = math.exp %36 : vector<8x8xf32>
    %cst_13 = arith.constant dense<0.000000e+00> : vector<8xf32>
    %38 = vector.multi_reduction <add>, %37, %cst_13 [1] : vector<8x8xf32> to vector<8xf32>
    %39 = vector.shape_cast %38 : vector<8xf32> to vector<8x1xf32>
    %40 = tpu.reciprocal %39 {approx = true} : vector<8x1xf32> -> vector<8x1xf32>
    %41 = vector.broadcast %40 : vector<8x1xf32> to vector<8x8xf32>
    %42 = arith.mulf %37, %41 : vector<8x8xf32>
    %43 = arith.truncf %42 : vector<8x8xf32> to vector<8x8xbf16>
    %cst_14 = arith.constant dense<0.000000e+00> : vector<8x8xf32>
    %44 = tpu.matmul %43, %28, %cst_14 {dimension_numbers = #tpu.dot_dimension_numbers<[1], [0], [0], [1], [0, 0, 1, 1], [], []>} : vector<8x8xbf16>, vector<8x8xbf16>, vector<8x8xf32> -> vector<8x8xf32>
    %45 = arith.truncf %44 : vector<8x8xf32> to vector<8x8xbf16>
    %c8 = arith.constant 8 : index
    %c0_15 = arith.constant 0 : index
    %46 = vector.load %arg3[%c8, %c0_15] : memref<32x32xbf16, #tpu.memory_space<vmem>>, vector<8x32xbf16>
    %cst_16 = arith.constant dense<0.000000e+00> : vector<8x32xf32>
    %47 = tpu.matmul %45, %46, %cst_16 {dimension_numbers = #tpu.dot_dimension_numbers<[1], [0], [0], [1], [0, 0, 1, 1], [], []>} : vector<8x8xbf16>, vector<8x32xbf16>, vector<8x32xf32> -> vector<8x32xf32>
    %48 = arith.addf %25, %47 : vector<8x32xf32>
    %49 = vector.extract_strided_slice %1 {offsets = [0, 16], sizes = [8, 8], strides = [1, 1]} : vector<8x96xbf16> to vector<8x8xbf16>
    %50 = vector.extract_strided_slice %1 {offsets = [0, 48], sizes = [8, 8], strides = [1, 1]} : vector<8x96xbf16> to vector<8x8xbf16>
    %51 = vector.extract_strided_slice %1 {offsets = [0, 80], sizes = [8, 8], strides = [1, 1]} : vector<8x96xbf16> to vector<8x8xbf16>
    %52 = tpu.transpose %50, [1, 0] : vector<8x8xbf16> -> vector<8x8xbf16>
    %cst_17 = arith.constant dense<0.000000e+00> : vector<8x8xf32>
    %53 = tpu.matmul %49, %52, %cst_17 {dimension_numbers = #tpu.dot_dimension_numbers<[1], [0], [0], [1], [0, 0, 1, 1], [], []>} : vector<8x8xbf16>, vector<8x8xbf16>, vector<8x8xf32> -> vector<8x8xf32>
    %cst_18 = arith.constant 0.353553385 : f32
    %54 = vector.broadcast %cst_18 : f32 to vector<8x8xf32>
    %55 = arith.mulf %53, %54 : vector<8x8xf32>
    %cst_19 = arith.constant dense<0xFF800000> : vector<8xf32>
    %56 = vector.multi_reduction <maximumf>, %55, %cst_19 [1] : vector<8x8xf32> to vector<8xf32>
    %57 = vector.shape_cast %56 : vector<8xf32> to vector<8x1xf32>
    %58 = vector.broadcast %57 : vector<8x1xf32> to vector<8x8xf32>
    %59 = arith.subf %55, %58 : vector<8x8xf32>
    %60 = math.exp %59 : vector<8x8xf32>
    %cst_20 = arith.constant dense<0.000000e+00> : vector<8xf32>
    %61 = vector.multi_reduction <add>, %60, %cst_20 [1] : vector<8x8xf32> to vector<8xf32>
    %62 = vector.shape_cast %61 : vector<8xf32> to vector<8x1xf32>
    %63 = tpu.reciprocal %62 {approx = true} : vector<8x1xf32> -> vector<8x1xf32>
    %64 = vector.broadcast %63 : vector<8x1xf32> to vector<8x8xf32>
    %65 = arith.mulf %60, %64 : vector<8x8xf32>
    %66 = arith.truncf %65 : vector<8x8xf32> to vector<8x8xbf16>
    %cst_21 = arith.constant dense<0.000000e+00> : vector<8x8xf32>
    %67 = tpu.matmul %66, %51, %cst_21 {dimension_numbers = #tpu.dot_dimension_numbers<[1], [0], [0], [1], [0, 0, 1, 1], [], []>} : vector<8x8xbf16>, vector<8x8xbf16>, vector<8x8xf32> -> vector<8x8xf32>
    %68 = arith.truncf %67 : vector<8x8xf32> to vector<8x8xbf16>
    %c16 = arith.constant 16 : index
    %c0_22 = arith.constant 0 : index
    %69 = vector.load %arg3[%c16, %c0_22] : memref<32x32xbf16, #tpu.memory_space<vmem>>, vector<8x32xbf16>
    %cst_23 = arith.constant dense<0.000000e+00> : vector<8x32xf32>
    %70 = tpu.matmul %68, %69, %cst_23 {dimension_numbers = #tpu.dot_dimension_numbers<[1], [0], [0], [1], [0, 0, 1, 1], [], []>} : vector<8x8xbf16>, vector<8x32xbf16>, vector<8x32xf32> -> vector<8x32xf32>
    %71 = arith.addf %48, %70 : vector<8x32xf32>
    %72 = vector.extract_strided_slice %1 {offsets = [0, 24], sizes = [8, 8], strides = [1, 1]} : vector<8x96xbf16> to vector<8x8xbf16>
    %73 = vector.extract_strided_slice %1 {offsets = [0, 56], sizes = [8, 8], strides = [1, 1]} : vector<8x96xbf16> to vector<8x8xbf16>
    %74 = vector.extract_strided_slice %1 {offsets = [0, 88], sizes = [8, 8], strides = [1, 1]} : vector<8x96xbf16> to vector<8x8xbf16>
    %75 = tpu.transpose %73, [1, 0] : vector<8x8xbf16> -> vector<8x8xbf16>
    %cst_24 = arith.constant dense<0.000000e+00> : vector<8x8xf32>
    %76 = tpu.matmul %72, %75, %cst_24 {dimension_numbers = #tpu.dot_dimension_numbers<[1], [0], [0], [1], [0, 0, 1, 1], [], []>} : vector<8x8xbf16>, vector<8x8xbf16>, vector<8x8xf32> -> vector<8x8xf32>
    %cst_25 = arith.constant 0.353553385 : f32
    %77 = vector.broadcast %cst_25 : f32 to vector<8x8xf32>
    %78 = arith.mulf %76, %77 : vector<8x8xf32>
    %cst_26 = arith.constant dense<0xFF800000> : vector<8xf32>
    %79 = vector.multi_reduction <maximumf>, %78, %cst_26 [1] : vector<8x8xf32> to vector<8xf32>
    %80 = vector.shape_cast %79 : vector<8xf32> to vector<8x1xf32>
    %81 = vector.broadcast %80 : vector<8x1xf32> to vector<8x8xf32>
    %82 = arith.subf %78, %81 : vector<8x8xf32>
    %83 = math.exp %82 : vector<8x8xf32>
    %cst_27 = arith.constant dense<0.000000e+00> : vector<8xf32>
    %84 = vector.multi_reduction <add>, %83, %cst_27 [1] : vector<8x8xf32> to vector<8xf32>
    %85 = vector.shape_cast %84 : vector<8xf32> to vector<8x1xf32>
    %86 = tpu.reciprocal %85 {approx = true} : vector<8x1xf32> -> vector<8x1xf32>
    %87 = vector.broadcast %86 : vector<8x1xf32> to vector<8x8xf32>
    %88 = arith.mulf %83, %87 : vector<8x8xf32>
    %89 = arith.truncf %88 : vector<8x8xf32> to vector<8x8xbf16>
    %cst_28 = arith.constant dense<0.000000e+00> : vector<8x8xf32>
    %90 = tpu.matmul %89, %74, %cst_28 {dimension_numbers = #tpu.dot_dimension_numbers<[1], [0], [0], [1], [0, 0, 1, 1], [], []>} : vector<8x8xbf16>, vector<8x8xbf16>, vector<8x8xf32> -> vector<8x8xf32>
    %91 = arith.truncf %90 : vector<8x8xf32> to vector<8x8xbf16>
    %c24 = arith.constant 24 : index
    %c0_29 = arith.constant 0 : index
    %92 = vector.load %arg3[%c24, %c0_29] : memref<32x32xbf16, #tpu.memory_space<vmem>>, vector<8x32xbf16>
    %cst_30 = arith.constant dense<0.000000e+00> : vector<8x32xf32>
    %93 = tpu.matmul %91, %92, %cst_30 {dimension_numbers = #tpu.dot_dimension_numbers<[1], [0], [0], [1], [0, 0, 1, 1], [], []>} : vector<8x8xbf16>, vector<8x32xbf16>, vector<8x32xf32> -> vector<8x32xf32>
    %94 = arith.addf %71, %93 : vector<8x32xf32>
    %c0_31 = arith.constant 0 : index
    %c0_32 = arith.constant 0 : index
    %95 = vector.load %arg4[%c0_31, %c0_32] : memref<1x32xf32, #tpu.memory_space<vmem>>, vector<1x32xf32>
    %96 = vector.broadcast %95 : vector<1x32xf32> to vector<8x32xf32>
    %97 = arith.addf %94, %96 : vector<8x32xf32>
    %c0_33 = arith.constant 0 : index
    %c0_34 = arith.constant 0 : index
    %c0_35 = arith.constant 0 : index
    %98 = vector.load %arg2[%c0_33, %c0_34, %c0_35] : memref<1x8x32xf32, #tpu.memory_space<vmem>>, vector<1x8x32xf32>
    %99 = vector.shape_cast %98 : vector<1x8x32xf32> to vector<8x32xf32>
    %100 = arith.addf %97, %99 : vector<8x32xf32>
    %cst_36 = arith.constant dense<0.000000e+00> : vector<8xf32>
    %101 = vector.multi_reduction <add>, %100, %cst_36 [1] : vector<8x32xf32> to vector<8xf32>
    %102 = vector.shape_cast %101 : vector<8xf32> to vector<8x1xf32>
    %cst_37 = arith.constant 3.200000e+01 : f32
    %103 = vector.broadcast %cst_37 : f32 to vector<8x1xf32>
    %104 = arith.divf %102, %103 : vector<8x1xf32>
    %105 = vector.broadcast %104 : vector<8x1xf32> to vector<8x32xf32>
    %106 = arith.subf %100, %105 : vector<8x32xf32>
    %107 = arith.mulf %106, %106 : vector<8x32xf32>
    %cst_38 = arith.constant dense<0.000000e+00> : vector<8xf32>
    %108 = vector.multi_reduction <add>, %107, %cst_38 [1] : vector<8x32xf32> to vector<8xf32>
    %109 = vector.shape_cast %108 : vector<8xf32> to vector<8x1xf32>
    %cst_39 = arith.constant 3.200000e+01 : f32
    %110 = vector.broadcast %cst_39 : f32 to vector<8x1xf32>
    %111 = arith.divf %109, %110 : vector<8x1xf32>
    %cst_40 = arith.constant 9.99999974E-6 : f32
    %112 = vector.broadcast %cst_40 : f32 to vector<8x1xf32>
    %113 = arith.addf %111, %112 : vector<8x1xf32>
    %114 = math.rsqrt %113 : vector<8x1xf32>
    %115 = vector.broadcast %114 : vector<8x1xf32> to vector<8x32xf32>
    %116 = arith.mulf %106, %115 : vector<8x32xf32>
    %c0_41 = arith.constant 0 : index
    %c0_42 = arith.constant 0 : index
    %117 = vector.load %arg5[%c0_41, %c0_42] : memref<1x32xf32, #tpu.memory_space<vmem>>, vector<1x32xf32>
    %118 = vector.broadcast %117 : vector<1x32xf32> to vector<8x32xf32>
    %119 = arith.mulf %116, %118 : vector<8x32xf32>
    %c0_43 = arith.constant 0 : index
    %c0_44 = arith.constant 0 : index
    %120 = vector.load %arg6[%c0_43, %c0_44] : memref<1x32xf32, #tpu.memory_space<vmem>>, vector<1x32xf32>
    %121 = vector.broadcast %120 : vector<1x32xf32> to vector<8x32xf32>
    %122 = arith.addf %119, %121 : vector<8x32xf32>
    %c0_45 = arith.constant 0 : index
    %c0_46 = arith.constant 0 : index
    %c0_47 = arith.constant 0 : index
    %123 = vector.load %arg7[%c0_45, %c0_46, %c0_47] : memref<1x8x32xf32, #tpu.memory_space<vmem>>, vector<1x8x32xf32>
    %124 = vector.shape_cast %123 : vector<1x8x32xf32> to vector<8x32xf32>
    %125 = vector.shape_cast %122 : vector<8x32xf32> to vector<1x8x32xf32>
    tpu.vector_store %arg7[%c0_45, %c0_46, %c0_47], %125 {strides = array<i32>} : memref<1x8x32xf32, #tpu.memory_space<vmem>>, vector<1x8x32xf32>,
    return
  }
  func.func @transform_0(%arg0: i32) -> (i32, i32, i32) {
    %c0_i32 = arith.constant 0 : i32
    %c0_i32_0 = arith.constant 0 : i32
    %c0_i32_1 = arith.constant 0 : i32
    return %arg0, %c0_i32, %c0_i32_0 : i32, i32, i32
  }
  func.func @transform_1(%arg0: i32) -> (i32, i32, i32) {
    %c0_i32 = arith.constant 0 : i32
    %c0_i32_0 = arith.constant 0 : i32
    %c0_i32_1 = arith.constant 0 : i32
    return %arg0, %c0_i32, %c0_i32_0 : i32, i32, i32
  }
  func.func @transform_2(%arg0: i32) -> (i32, i32) {
    %c0_i32 = arith.constant 0 : i32
    %c0_i32_0 = arith.constant 0 : i32
    %c0_i32_1 = arith.constant 0 : i32
    return %c0_i32, %c0_i32_0 : i32, i32
  }
  func.func @transform_3(%arg0: i32) -> (i32, i32) {
    %c0_i32 = arith.constant 0 : i32
    %c0_i32_0 = arith.constant 0 : i32
    %c0_i32_1 = arith.constant 0 : i32
    return %c0_i32, %c0_i32_0 : i32, i32
  }
  func.func @transform_4(%arg0: i32) -> (i32, i32) {
    %c0_i32 = arith.constant 0 : i32
    %c0_i32_0 = arith.constant 0 : i32
    %c0_i32_1 = arith.constant 0 : i32
    return %c0_i32, %c0_i32_0 : i32, i32
  }
  func.func @transform_5(%arg0: i32) -> (i32, i32) {
    %c0_i32 = arith.constant 0 : i32
    %c0_i32_0 = arith.constant 0 : i32
    %c0_i32_1 = arith.constant 0 : i32
    return %c0_i32, %c0_i32_0 : i32, i32
  }
  func.func @transform_6(%arg0: i32) -> (i32, i32, i32) {
    %c0_i32 = arith.constant 0 : i32
    %c0_i32_0 = arith.constant 0 : i32
    %c0_i32_1 = arith.constant 0 : i32
    return %arg0, %c0_i32, %c0_i32_0 : i32, i32, i32
  }
}

module attributes {stable_mosaic.version = 11 : i64} {
  func.func @_ffn_ln_kernel(%arg0: i32, %arg1: memref<16x32xf32, #tpu.memory_space<vmem>>, %arg2: memref<32x64xbf16, #tpu.memory_space<vmem>>, %arg3: memref<1x64xf32, #tpu.memory_space<vmem>>, %arg4: memref<64x32xbf16, #tpu.memory_space<vmem>>, %arg5: memref<1x32xf32, #tpu.memory_space<vmem>>, %arg6: memref<1x32xf32, #tpu.memory_space<vmem>>, %arg7: memref<1x32xf32, #tpu.memory_space<vmem>>, %arg8: memref<16x32xf32, #tpu.memory_space<vmem>>) attributes {dimension_semantics = [#tpu.dimension_semantics<parallel>], iteration_bounds = array<i64: 1>, scalar_prefetch = 0 : i64, scratch_operands = 0 : i64, tpu.core_type = #tpu.core_type<tc>, window_params = [{transform_indices = @transform_0, window_bounds = array<i64: 16, 32>}, {pipeline_mode = #tpu.pipeline_mode<synchronous>, transform_indices = @transform_1, window_bounds = array<i64: 32, 64>}, {pipeline_mode = #tpu.pipeline_mode<synchronous>, transform_indices = @transform_2, window_bounds = array<i64: 1, 64>}, {pipeline_mode = #tpu.pipeline_mode<synchronous>, transform_indices = @transform_3, window_bounds = array<i64: 64, 32>}, {pipeline_mode = #tpu.pipeline_mode<synchronous>, transform_indices = @transform_4, window_bounds = array<i64: 1, 32>}, {pipeline_mode = #tpu.pipeline_mode<synchronous>, transform_indices = @transform_5, window_bounds = array<i64: 1, 32>}, {pipeline_mode = #tpu.pipeline_mode<synchronous>, transform_indices = @transform_6, window_bounds = array<i64: 1, 32>}, {transform_indices = @transform_7, window_bounds = array<i64: 16, 32>}]} {
    %c0 = arith.constant 0 : index
    %c0_0 = arith.constant 0 : index
    %0 = vector.load %arg1[%c0, %c0_0] : memref<16x32xf32, #tpu.memory_space<vmem>>, vector<16x32xf32>
    %1 = arith.truncf %0 : vector<16x32xf32> to vector<16x32xbf16>
    %c0_1 = arith.constant 0 : index
    %c0_2 = arith.constant 0 : index
    %2 = vector.load %arg2[%c0_1, %c0_2] : memref<32x64xbf16, #tpu.memory_space<vmem>>, vector<32x64xbf16>
    %cst = arith.constant dense<0.000000e+00> : vector<16x64xf32>
    %3 = tpu.matmul %1, %2, %cst {dimension_numbers = #tpu.dot_dimension_numbers<[1], [0], [0], [1], [0, 0, 1, 1], [], []>} : vector<16x32xbf16>, vector<32x64xbf16>, vector<16x64xf32> -> vector<16x64xf32>
    %c0_3 = arith.constant 0 : index
    %c0_4 = arith.constant 0 : index
    %4 = vector.load %arg3[%c0_3, %c0_4] : memref<1x64xf32, #tpu.memory_space<vmem>>, vector<1x64xf32>
    %5 = vector.broadcast %4 : vector<1x64xf32> to vector<16x64xf32>
    %6 = arith.addf %3, %5 : vector<16x64xf32>
    %cst_5 = arith.constant 0.000000e+00 : f32
    %7 = vector.broadcast %cst_5 : f32 to vector<16x64xf32>
    %8 = arith.maximumf %6, %7 : vector<16x64xf32>
    %9 = arith.truncf %8 : vector<16x64xf32> to vector<16x64xbf16>
    %c0_6 = arith.constant 0 : index
    %c0_7 = arith.constant 0 : index
    %10 = vector.load %arg4[%c0_6, %c0_7] : memref<64x32xbf16, #tpu.memory_space<vmem>>, vector<64x32xbf16>
    %cst_8 = arith.constant dense<0.000000e+00> : vector<16x32xf32>
    %11 = tpu.matmul %9, %10, %cst_8 {dimension_numbers = #tpu.dot_dimension_numbers<[1], [0], [0], [1], [0, 0, 1, 1], [], []>} : vector<16x64xbf16>, vector<64x32xbf16>, vector<16x32xf32> -> vector<16x32xf32>
    %c0_9 = arith.constant 0 : index
    %c0_10 = arith.constant 0 : index
    %12 = vector.load %arg5[%c0_9, %c0_10] : memref<1x32xf32, #tpu.memory_space<vmem>>, vector<1x32xf32>
    %13 = vector.broadcast %12 : vector<1x32xf32> to vector<16x32xf32>
    %14 = arith.addf %11, %13 : vector<16x32xf32>
    %15 = arith.addf %14, %0 : vector<16x32xf32>
    %cst_11 = arith.constant dense<0.000000e+00> : vector<16xf32>
    %16 = vector.multi_reduction <add>, %15, %cst_11 [1] : vector<16x32xf32> to vector<16xf32>
    %17 = vector.shape_cast %16 : vector<16xf32> to vector<16x1xf32>
    %cst_12 = arith.constant 3.200000e+01 : f32
    %18 = vector.broadcast %cst_12 : f32 to vector<16x1xf32>
    %19 = arith.divf %17, %18 : vector<16x1xf32>
    %20 = vector.broadcast %19 : vector<16x1xf32> to vector<16x32xf32>
    %21 = arith.subf %15, %20 : vector<16x32xf32>
    %22 = arith.mulf %21, %21 : vector<16x32xf32>
    %cst_13 = arith.constant dense<0.000000e+00> : vector<16xf32>
    %23 = vector.multi_reduction <add>, %22, %cst_13 [1] : vector<16x32xf32> to vector<16xf32>
    %24 = vector.shape_cast %23 : vector<16xf32> to vector<16x1xf32>
    %cst_14 = arith.constant 3.200000e+01 : f32
    %25 = vector.broadcast %cst_14 : f32 to vector<16x1xf32>
    %26 = arith.divf %24, %25 : vector<16x1xf32>
    %cst_15 = arith.constant 9.99999974E-6 : f32
    %27 = vector.broadcast %cst_15 : f32 to vector<16x1xf32>
    %28 = arith.addf %26, %27 : vector<16x1xf32>
    %29 = math.rsqrt %28 : vector<16x1xf32>
    %30 = vector.broadcast %29 : vector<16x1xf32> to vector<16x32xf32>
    %31 = arith.mulf %21, %30 : vector<16x32xf32>
    %c0_16 = arith.constant 0 : index
    %c0_17 = arith.constant 0 : index
    %32 = vector.load %arg6[%c0_16, %c0_17] : memref<1x32xf32, #tpu.memory_space<vmem>>, vector<1x32xf32>
    %33 = vector.broadcast %32 : vector<1x32xf32> to vector<16x32xf32>
    %34 = arith.mulf %31, %33 : vector<16x32xf32>
    %c0_18 = arith.constant 0 : index
    %c0_19 = arith.constant 0 : index
    %35 = vector.load %arg7[%c0_18, %c0_19] : memref<1x32xf32, #tpu.memory_space<vmem>>, vector<1x32xf32>
    %36 = vector.broadcast %35 : vector<1x32xf32> to vector<16x32xf32>
    %37 = arith.addf %34, %36 : vector<16x32xf32>
    %c0_20 = arith.constant 0 : index
    %c0_21 = arith.constant 0 : index
    %38 = vector.load %arg8[%c0_20, %c0_21] : memref<16x32xf32, #tpu.memory_space<vmem>>, vector<16x32xf32>
    tpu.vector_store %arg8[%c0_20, %c0_21], %37 {strides = array<i32>} : memref<16x32xf32, #tpu.memory_space<vmem>>, vector<16x32xf32>,
    return
  }
  func.func @transform_0(%arg0: i32) -> (i32, i32) {
    %c0_i32 = arith.constant 0 : i32
    %c0_i32_0 = arith.constant 0 : i32
    return %arg0, %c0_i32 : i32, i32
  }
  func.func @transform_1(%arg0: i32) -> (i32, i32) {
    %c0_i32 = arith.constant 0 : i32
    %c0_i32_0 = arith.constant 0 : i32
    %c0_i32_1 = arith.constant 0 : i32
    return %c0_i32, %c0_i32_0 : i32, i32
  }
  func.func @transform_2(%arg0: i32) -> (i32, i32) {
    %c0_i32 = arith.constant 0 : i32
    %c0_i32_0 = arith.constant 0 : i32
    %c0_i32_1 = arith.constant 0 : i32
    return %c0_i32, %c0_i32_0 : i32, i32
  }
  func.func @transform_3(%arg0: i32) -> (i32, i32) {
    %c0_i32 = arith.constant 0 : i32
    %c0_i32_0 = arith.constant 0 : i32
    %c0_i32_1 = arith.constant 0 : i32
    return %c0_i32, %c0_i32_0 : i32, i32
  }
  func.func @transform_4(%arg0: i32) -> (i32, i32) {
    %c0_i32 = arith.constant 0 : i32
    %c0_i32_0 = arith.constant 0 : i32
    %c0_i32_1 = arith.constant 0 : i32
    return %c0_i32, %c0_i32_0 : i32, i32
  }
  func.func @transform_5(%arg0: i32) -> (i32, i32) {
    %c0_i32 = arith.constant 0 : i32
    %c0_i32_0 = arith.constant 0 : i32
    %c0_i32_1 = arith.constant 0 : i32
    return %c0_i32, %c0_i32_0 : i32, i32
  }
  func.func @transform_6(%arg0: i32) -> (i32, i32) {
    %c0_i32 = arith.constant 0 : i32
    %c0_i32_0 = arith.constant 0 : i32
    %c0_i32_1 = arith.constant 0 : i32
    return %c0_i32, %c0_i32_0 : i32, i32
  }
  func.func @transform_7(%arg0: i32) -> (i32, i32) {
    %c0_i32 = arith.constant 0 : i32
    %c0_i32_0 = arith.constant 0 : i32
    return %arg0, %c0_i32 : i32, i32
  }
}

module attributes {stable_mosaic.version = 11 : i64} {
  func.func @_cls_logsoftmax_kernel(%arg0: i32, %arg1: memref<16x32xbf16, #tpu.memory_space<vmem>>, %arg2: memref<32x16xbf16, #tpu.memory_space<vmem>>, %arg3: memref<1x16xf32, #tpu.memory_space<vmem>>, %arg4: memref<16x16xf32, #tpu.memory_space<vmem>>) attributes {dimension_semantics = [#tpu.dimension_semantics<parallel>], iteration_bounds = array<i64: 1>, scalar_prefetch = 0 : i64, scratch_operands = 0 : i64, tpu.core_type = #tpu.core_type<tc>, window_params = [{transform_indices = @transform_0, window_bounds = array<i64: 16, 32>}, {pipeline_mode = #tpu.pipeline_mode<synchronous>, transform_indices = @transform_1, window_bounds = array<i64: 32, 16>}, {pipeline_mode = #tpu.pipeline_mode<synchronous>, transform_indices = @transform_2, window_bounds = array<i64: 1, 16>}, {transform_indices = @transform_3, window_bounds = array<i64: 16, 16>}]} {
    %c0 = arith.constant 0 : index
    %c0_0 = arith.constant 0 : index
    %0 = vector.load %arg1[%c0, %c0_0] : memref<16x32xbf16, #tpu.memory_space<vmem>>, vector<16x32xbf16>
    %c0_1 = arith.constant 0 : index
    %c0_2 = arith.constant 0 : index
    %1 = vector.load %arg2[%c0_1, %c0_2] : memref<32x16xbf16, #tpu.memory_space<vmem>>, vector<32x16xbf16>
    %cst = arith.constant dense<0.000000e+00> : vector<16x16xf32>
    %2 = tpu.matmul %0, %1, %cst {dimension_numbers = #tpu.dot_dimension_numbers<[1], [0], [0], [1], [0, 0, 1, 1], [], []>} : vector<16x32xbf16>, vector<32x16xbf16>, vector<16x16xf32> -> vector<16x16xf32>
    %c0_3 = arith.constant 0 : index
    %c0_4 = arith.constant 0 : index
    %3 = vector.load %arg3[%c0_3, %c0_4] : memref<1x16xf32, #tpu.memory_space<vmem>>, vector<1x16xf32>
    %4 = vector.broadcast %3 : vector<1x16xf32> to vector<16x16xf32>
    %5 = arith.addf %2, %4 : vector<16x16xf32>
    %cst_5 = arith.constant dense<0xFF800000> : vector<16xf32>
    %6 = vector.multi_reduction <maximumf>, %5, %cst_5 [1] : vector<16x16xf32> to vector<16xf32>
    %7 = vector.shape_cast %6 : vector<16xf32> to vector<16x1xf32>
    %8 = vector.broadcast %7 : vector<16x1xf32> to vector<16x16xf32>
    %9 = arith.subf %5, %8 : vector<16x16xf32>
    %10 = math.exp %9 : vector<16x16xf32>
    %cst_6 = arith.constant dense<0.000000e+00> : vector<16xf32>
    %11 = vector.multi_reduction <add>, %10, %cst_6 [1] : vector<16x16xf32> to vector<16xf32>
    %12 = vector.shape_cast %11 : vector<16xf32> to vector<16x1xf32>
    %13 = vector.broadcast %7 : vector<16x1xf32> to vector<16x16xf32>
    %14 = arith.subf %5, %13 : vector<16x16xf32>
    %15 = math.log %12 : vector<16x1xf32>
    %16 = vector.broadcast %15 : vector<16x1xf32> to vector<16x16xf32>
    %17 = arith.subf %14, %16 : vector<16x16xf32>
    %c0_7 = arith.constant 0 : index
    %c0_8 = arith.constant 0 : index
    %18 = vector.load %arg4[%c0_7, %c0_8] : memref<16x16xf32, #tpu.memory_space<vmem>>, vector<16x16xf32>
    tpu.vector_store %arg4[%c0_7, %c0_8], %17 {strides = array<i32>} : memref<16x16xf32, #tpu.memory_space<vmem>>, vector<16x16xf32>,
    return
  }
  func.func @transform_0(%arg0: i32) -> (i32, i32) {
    %c0_i32 = arith.constant 0 : i32
    %c0_i32_0 = arith.constant 0 : i32
    return %arg0, %c0_i32 : i32, i32
  }
  func.func @transform_1(%arg0: i32) -> (i32, i32) {
    %c0_i32 = arith.constant 0 : i32
    %c0_i32_0 = arith.constant 0 : i32
    %c0_i32_1 = arith.constant 0 : i32
    return %c0_i32, %c0_i32_0 : i32, i32
  }
  func.func @transform_2(%arg0: i32) -> (i32, i32) {
    %c0_i32 = arith.constant 0 : i32
    %c0_i32_0 = arith.constant 0 : i32
    %c0_i32_1 = arith.constant 0 : i32
    return %c0_i32, %c0_i32_0 : i32, i32
  }
  func.func @transform_3(%arg0: i32) -> (i32, i32) {
    %c0_i32 = arith.constant 0 : i32
    %c0_i32_0 = arith.constant 0 : i32
    return %arg0, %c0_i32 : i32, i32
  }
}

</mosaic_0001>

<bundles_post_ra>
// kernel: early_encoder_forward.10
= control target key start
LH: loop header
LB: loop body
LE: loop exit
PB: predicated region body
PF: predicated region fallthrough
CT: control target
= control target key end

     0   :  { %s392_s12 = smov 0   ;;  %s418_s0 = inlined_call_operand.vmem [shape: bf16[2,17,24], index: 0, kind: input, shape index: {}]   ;;  %s419_s1 = inlined_call_operand.vmem [shape: bf16[24,32], index: 1, kind: input, shape index: {}]   ;;  %s420_s2 = inlined_call_operand.vmem [shape: f32[1,32], index: 2, kind: input, shape index: {}]   ;;  %s421_s3 = inlined_call_operand.vmem [shape: f32[2,17,32], index: 3, kind: output, shape index: {}]  }
   0x1 LB: > { %s321_s13 = sadd.s32 4294967295, %s370_s12   ;;  %p325_p0 = scmp.ge.s32.totalorder %s370_s12, 1  ;;  %s370_s12 = sphi %s392_s12, %s13_s12  }
   0x2   : > { %p137_p1 = scmp.lt.s32.totalorder %s370_s12, 3 }
   0x4   : > { %p138_p2 = pnand %p325_p0, %p137_p1 }
   0x5   : > { %v360_v0 = vld [vmem:[%s419_s1] sm:$0xff] (!%p138_p2)   ;;  %v361_v1 = vld [vmem:[%s419_s1 + $0x8] ss:$0 sps:$4 sm:$0xff] (!%p138_p2)   ;;  %vm209_vm0 = vcmask (!%p138_p2), 1043456   ;;  %p161_p3 = scmp.lt.s32.totalorder (!%p138_p2), %s321_s13, 1  ;;  %vm202_vm1 = vcmask (!%p138_p2), 195584  }
   0x6   : > { %141 = sbr.rel (%p138_p2) target bundleno = 237 (0xed), region = 32  ;;  %341 = vmatprep.subr.bf16.mxu0 (!%p138_p2), %v360_v0  ;;  %v211_v2 = vsel (!%p138_p2), %vm209_vm0, %v361_v1, 0  ;;  %v328_v5 = vld [vmem:[%s420_s2] ss:$0 sm:$0xff] (!%p138_p2)  ;;  %vm264_vm2 = vcmask (!%p138_p2), 253952   ;;  %vm261_vm3 = vcmask (!%p138_p2), 261120  }
   0x7   : > { %342 = vmatpush3.bf16.msra.mxu0 (!%p138_p2), %v360_v0 }
   0x8   : > { %349 = vmatprep.subr.msk.bf16.mxu0 (!%p138_p2), %vm209_vm0, %v361_v1 }
   0xb   : > { %344 = vmatpush3.bf16.msra.mxu0 (!%p138_p2), %v211_v2 }
   0xd   : > { %s423_s13 = smov (!%p161_p3, %s321_s13), 1 }
   0xe   : > { %s350_s18 = smul.u32 12, %s423_s13 }
   0xf   : > { %s351_s22 = smul.u32 24, %s423_s13 }
  0x10   : > { %s165_s21 = scalar_lea.vmem %s418_s0, %s350_s18 }
  0x11   : > { %v362_v3 = vld [vmem:[%s165_s21] sm:$0xff]   ;;  %v363_v4 = vld [vmem:[%s165_s21 + $0x8] ss:$0 sps:$4 sm:$0x11]   ;;  %s170_s27 = scalar_lea.vmem %s421_s3, %s351_s22 }
  0x12   : > { %345 = vmatprep.mubr.msk.bf16.mxu0 %vm202_vm1, %v362_v3 }
  0x13   : > { %346 = vmatmul.mubr.msk.bf16.vlgmr.msra.gmra.mrb[0].mxu0 %vm202_vm1, %v363_v4 }
  0xe6   : > { %v347_v6 = vpop.f32.mrb[0].mxu0 }
  0xe7   : > { %v256_v7 = vadd.f32 %v347_v6, %v328_v5  ;;  %v247_v8 = vpop.f32.mrb[1].mxu0 }
  0xe8   : > { %v248_v9 = vadd.f32 %v328_v5, %v247_v8  ;;  %v348_v10 = vpop.f32.mrb[2].mxu0 }
  0xe9   : > { %265 = vst.msk [vmem:[%s170_s27 + $0x10] sm:$0x1] %vm264_vm2, %v256_v7  ;;  %v250_v11 = vpop.f32.mrb[3].mxu0 }
  0xea   : > { %262 = vst.msk [vmem:[%s170_s27] sm:$0xff] %vm261_vm3, %v248_v9  ;;  %v251_v12 = vadd.f32 %v328_v5, %v250_v11 }
  0xec   : > { %263 = vst.msk [vmem:[%s170_s27 + $0x8] sm:$0xff] %vm261_vm3, %v251_v12 }
  0xed PF: > { %s13_s12 = sadd.s32 1, %s370_s12  }
  0xee   : > { %p10_p4 = scmp.ge.s32.totalorder %s13_s12, 4  }
  0xf0   :  { %12 = sbr.rel (!%p10_p4) target bundleno = 1 (0x1), region = 62 }

// kernel: early_encoder_forward.11
= control target key start
LH: loop header
LB: loop body
LE: loop exit
PB: predicated region body
PF: predicated region fallthrough
CT: control target
= control target key end

     0   :  { %s442_s15 = smov 0   ;;  %s483_s0 = inlined_call_operand.vmem [shape: bf16[2,8,96], index: 0, kind: input, shape index: {}]   ;;  %s484_s1 = inlined_call_operand.vmem [shape: bf16[96,32], index: 1, kind: input, shape index: {}]   ;;  %s485_s2 = inlined_call_operand.vmem [shape: f32[1,32], index: 2, kind: input, shape index: {}]   ;;  %s486_s3 = inlined_call_operand.vmem [shape: f32[8,32], index: 3, kind: input, shape index: {}]   ;;  %s487_s4 = inlined_call_operand.vmem [shape: f32[2,8,32], index: 4, kind: output, shape index: {}]  }
   0x1 LB: > { %s351_s16 = sadd.s32 4294967295, %s413_s15   ;;  %p355_p0 = scmp.ge.s32.totalorder %s413_s15, 1  ;;  %s413_s15 = sphi %s442_s15, %s14_s15  }
   0x2   : > { %p161_p1 = scmp.lt.s32.totalorder %s413_s15, 3 }
   0x4   : > { %p162_p2 = pnand %p355_p0, %p161_p1 }
   0x5   : > { %v401_v0 = vld [vmem:[%s484_s1] sm:$0xff] (!%p162_p2)   ;;  %v415_v1 = vmov (!%p162_p2), 0.0   ;;  %v402_v2 = vld [vmem:[%s484_s1 + $0x8] sm:$0xff] (!%p162_p2)   ;;  %vm416_vm0 = vmmov (!%p162_p2), 0   ;;  %v403_v3 = vld [vmem:[%s484_s1 + $0x10] sm:$0xff] (!%p162_p2)   ;;  %p185_p3 = scmp.lt.s32.totalorder (!%p162_p2), %s351_s16, 1 }
   0x6   : > { %165 = sbr.rel (%p162_p2) target bundleno = 247 (0xf7), region = 36  ;;  %375 = vmatprep.subr.bf16.mxu0 (!%p162_p2), %v415_v1  ;;  %387 = vmatprep.mubr.msk.bf16.mxu0 (!%p162_p2), %vm416_vm0, %v415_v1  ;;  %v404_v4 = vld [vmem:[%s484_s1 + $0x18] sm:$0xff] (!%p162_p2)   ;;  %v405_v5 = vld [vmem:[%s484_s1 + $0x20] sm:$0xff] (!%p162_p2)   ;;  %v406_v6 = vld [vmem:[%s484_s1 + $0x28] sm:$0xff] (!%p162_p2)   ;;  %vm250_vm1 = vcmask (!%p162_p2), 785408   ;;  %vm296_vm2 = vcmask (!%p162_p2), 261120  }
   0x7   : > { %376 = vmatpush3.bf16.msra.mxu0 (!%p162_p2), %v401_v0  ;;  %v358_v8 = vld [vmem:[%s485_s2] ss:$0 sm:$0xff] (!%p162_p2) }
   0x8   : > { %377 = vmatprep.subr.bf16.mxu0 (!%p162_p2), %v415_v1  ;;  %v294_v10 = vld [vmem:[%s486_s3] sm:$0xff] (!%p162_p2) }
   0xb   : > { %378 = vmatpush3.bf16.msra.mxu0 (!%p162_p2), %v402_v2 }
   0xc   : > { %379 = vmatprep.subr.bf16.mxu0 (!%p162_p2), %v415_v1 }
   0xd   : > { %s489_s16 = smov (!%p185_p3, %s351_s16), 1 }
   0xe   : > { %s356_s27 = sshll.u32 %s489_s16, 2  ;;  %s357_s9 = sshll.u32 %s489_s16, 3 }
   0xf   : > { %380 = vmatpush3.bf16.msra.mxu0 %v403_v3  ;;  %s188_s6 = scalar_lea.vmem %s483_s0, %s356_s27  ;;  %s192_s14 = scalar_lea.vmem %s487_s4, %s357_s9 }
  0x10   : > { %381 = vmatprep.subr.bf16.mxu0 %v415_v1  ;;  %v194_v7 = vld [vmem:[%s188_s6] sm:$0xf] }
  0x13   : > { %382 = vmatpush3.bf16.msra.mxu0 %v404_v4 }
  0x14   : > { %383 = vmatprep.subr.bf16.mxu0 %v415_v1 }
  0x17   : > { %384 = vmatpush3.bf16.msra.mxu0 %v405_v5 }
  0x18   : > { %385 = vmatprep.subr.bf16.mxu0 %v415_v1 }
  0x1b   : > { %386 = vmatpush3.bf16.msra.mxu0 %v406_v6 }
  0x1e   : > { %388 = vmatmul.mubr.msk.bf16.vlgmr.msra.gmra.mrb[0].mxu0 %vm250_vm1, %v194_v7 }
  0xf1   : > { %v288_v9 = vpop.f32.mrb[0].mxu0 }
  0xf2   : > { %v289_v11 = vadd.f32 %v358_v8, %v288_v9  ;;  %v389_v12 = vpop.f32.mrb[1].mxu0 }
  0xf3   : > { %v291_v13 = vpop.f32.mrb[2].mxu0 }
  0xf4   : > { %v295_v14 = vadd.f32 %v294_v10, %v289_v11  ;;  %v390_v15 = vpop.f32.mrb[3].mxu0 }
  0xf6   : > { %297 = vst.msk [vmem:[%s192_s14] sm:$0xff] %vm296_vm2, %v295_v14 }
  0xf7 PF: > { %s14_s15 = sadd.s32 1, %s413_s15  }
  0xf8   : > { %p11_p4 = scmp.ge.s32.totalorder %s14_s15, 4  }
  0xfa   :  { %13 = sbr.rel (!%p11_p4) target bundleno = 1 (0x1), region = 66 }

// kernel: early_encoder_forward.12
= control target key start
LH: loop header
LB: loop body
LE: loop exit
PB: predicated region body
PF: predicated region fallthrough
CT: control target
= control target key end

     0   :  { %v130_v0 = vmov 0.0   ;;  %vm131_vm0 = vmmov 0   ;;  %vm45_vm1 = vcmask 261120   ;;  %vm98_vm2 = vcmask 781312   ;;  %s170_s1 = inlined_call_operand.vmem [shape: bf16[32,96], index: 1, kind: input, shape index: {}]   ;;  %s171_s0 = inlined_call_operand.vmem [shape: bf16[16,32], index: 0, kind: input, shape index: {}]   ;;  %s172_s2 = inlined_call_operand.vmem [shape: f32[1,96], index: 2, kind: input, shape index: {}]   ;;  %s173_s3 = inlined_call_operand.vmem [shape: bf16[16,96], index: 3, kind: output, shape index: {}]  }
   0x1   :  { %117 = vmatprep.subr.bf16.mxu0 %v130_v0  ;;  %v127_v1 = vld [vmem:[%s170_s1] sm:$0xff]   ;;  %121 = vmatprep.mubr.msk.bf16.mxu0 %vm131_vm0, %v130_v0  ;;  %v128_v2 = vld [vmem:[%s170_s1 + $0x8] sm:$0xff]  }
   0x2   :  { %118 = vmatpush3.bf16.msra.mxu0 %v127_v1  ;;  %v129_v3 = vld [vmem:[%s171_s0] sm:$0xff]  }
   0x3   :  { %119 = vmatprep.subr.bf16.mxu0 %v130_v0  ;;  %v105_v4 = vld [vmem:[%s172_s2] ss:$0 sm:$0xff] }
   0x6   :  { %120 = vmatpush3.bf16.msra.mxu0 %v128_v2 }
   0x9   :  { %122 = vmatmul.mubr.msk.bf16.vlgmr.msra.gmra.mrb[0].mxu0 %vm45_vm1, %v129_v3 }
  0xdc   :  { %v83_v5 = vpop.f32.mrb[0].mxu0 }
  0xdd   :  { %v84_v6 = vadd.f32 %v105_v4, %v83_v5  ;;  %v123_v7 = vpop.f32.mrb[1].mxu0 }
  0xde   :  { %v86_v8 = vpop.f32.mrb[2].mxu0 }
  0xdf   :  { %v112_v9 = vpack.c.bf16 %v84_v6, %v84_v6  ;;  %v87_v10 = vadd.f32 %v105_v4, %v86_v8  ;;  %v124_v11 = vpop.f32.mrb[3].mxu0 }
  0xe1   :  { %99 = vst.msk [vmem:[%s173_s3] sm:$0xf] %vm98_vm2, %v112_v9  ;;  %v113_v12 = vpack.c.bf16 %v87_v10, %v87_v10 }
  0xe3   :  { %100 = vst.msk [vmem:[%s173_s3 + $0x4] sm:$0xf] %vm98_vm2, %v113_v12 }

// kernel: early_encoder_forward.19
= control target key start
LH: loop header
LB: loop body
LE: loop exit
PB: predicated region body
PF: predicated region fallthrough
CT: control target
= control target key end

     0   :  { %v150_v0 = vmov 0.0   ;;  %vm151_vm0 = vmmov 0   ;;  %vm45_vm1 = vcmask 261120   ;;  %vm90_vm2 = vcmask 130048   ;;  %s196_s1 = inlined_call_operand.vmem [shape: bf16[32,16], index: 1, kind: input, shape index: {}]   ;;  %s197_s0 = inlined_call_operand.vmem [shape: bf16[16,32], index: 0, kind: input, shape index: {}]   ;;  %s198_s2 = inlined_call_operand.vmem [shape: f32[1,16], index: 2, kind: input, shape index: {}]   ;;  %s199_s3 = inlined_call_operand.vmem [shape: f32[16,16], index: 3, kind: output, shape index: {}]  }
   0x1   :  { %129 = vmatprep.subr.bf16.mxu0 %v150_v0  ;;  %v139_v1 = vld [vmem:[%s196_s1] sm:$0xff]   ;;  %133 = vmatprep.mubr.msk.bf16.mxu0 %vm151_vm0, %v150_v0  ;;  %v140_v2 = vld [vmem:[%s196_s1 + $0x8] sm:$0xff]  }
   0x2   :  { %130 = vmatpush3.bf16.msra.mxu0 %v139_v1  ;;  %v141_v3 = vld [vmem:[%s197_s0] sm:$0xff]  }
   0x3   :  { %131 = vmatprep.subr.bf16.mxu0 %v150_v0  ;;  %v121_v4 = vld [vmem:[%s198_s2] ss:$0 sm:$0xff] }
   0x6   :  { %132 = vmatpush3.bf16.msra.mxu0 %v140_v2 }
   0x9   :  { %134 = vmatmul.mubr.msk.bf16.vlgmr.msra.gmra.mrb[0].mxu0 %vm45_vm1, %v141_v3 }
  0xdc   :  { %v83_v5 = vpop.f32.mrb[0].mxu0 }
  0xdd   :  { %v84_v6 = vadd.f32 %v121_v4, %v83_v5  ;;  %v135_v7 = vpop.f32.mrb[1].mxu0 }
  0xde   :  { %v86_v8 = vpop.f32.mrb[2].mxu0 }
  0xdf   :  { %v87_v9 = vadd.f32 %v121_v4, %v86_v8  ;;  %v136_v10 = vpop.f32.mrb[3].mxu0  ;;  %v91_v11 = vsel %vm90_vm2, %v84_v6, -inf }
  0xe0   :  { %92 = vmax.xlane.f32.xlu0 %v91_v11 }
  0xe1   :  { %v94_v12 = vsel %vm90_vm2, %v87_v9, -inf }
  0xe4   :  { %95 = vmax.xlane.f32.xlu0 %v94_v12 }
 0x16d   :  { %v93_v13 = vpop.xlane.xlu0 %92 }
 0x16e   :  { %v97_v14 = vsub.f32 %v84_v6, %v93_v13 }
 0x170   :  { %v99_v15 = vmul.f32 1.442695, %v97_v14 }
 0x171   :  { %v96_v16 = vpop.xlane.xlu0 %95 }
 0x172   :  { %142 = vpow2.f32 %v99_v15  ;;  %v98_v17 = vsub.f32 %v87_v9, %v96_v16 }
 0x174   :  { %v101_v18 = vmul.f32 1.442695, %v98_v17 }
 0x176   :  { %144 = vpow2.f32 %v101_v18 }
 0x17c   :  { %v143_v19 = vpop.eup %142 }
 0x17d   :  { %v103_v20 = vsel %vm90_vm2, %v143_v19, 0.0 }
 0x17e   :  { %104 = vadd.xlane.f32.xlu1 %v103_v20 }
 0x180   :  { %v145_v21 = vpop.eup %144 }
 0x181   :  { %v106_v22 = vsel %vm90_vm2, %v145_v21, 0.0 }
 0x182   :  { %107 = vadd.xlane.f32.xlu1 %v106_v22 }
 0x20b   :  { %v105_v23 = vpop.xlane.xlu1 %104 }
 0x20c   :  { %146 = vlog2.f32 %v105_v23 }
 0x20f   :  { %v108_v24 = vpop.xlane.xlu1 %107 }
 0x210   :  { %148 = vlog2.f32 %v108_v24 }
 0x216   :  { %v147_v25 = vpop.eup %146 }
 0x217   :  { %v110_v26 = vmul.f32 0.6931472, %v147_v25 }
 0x219   :  { %v113_v27 = vsub.f32 %v97_v14, %v110_v26 }
 0x21a   :  { %v149_v28 = vpop.eup %148 }
 0x21b   :  { %115 = vst.msk [vmem:[%s199_s3] sm:$0xff] %vm90_vm2, %v113_v27  ;;  %v112_v29 = vmul.f32 0.6931472, %v149_v28 }
 0x21d   :  { %v114_v30 = vsub.f32 %v98_v17, %v112_v29 }
 0x21f   :  { %116 = vst.msk [vmem:[%s199_s3 + $0x8] sm:$0xff] %vm90_vm2, %v114_v30 }

// kernel: early_encoder_forward.14
= control target key start
LH: loop header
LB: loop body
LE: loop exit
PB: predicated region body
PF: predicated region fallthrough
CT: control target
= control target key end

     0   :  { %v290_v0 = vmov 0.0   ;;  %vm291_vm0 = vmmov 0   ;;  %vm53_vm1 = vcmask 261120   ;;  %vm140_vm2 = vcmask 523264   ;;  %s381_s1 = inlined_call_operand.vmem [shape: bf16[32,64], index: 1, kind: input, shape index: {}]   ;;  %s382_s0 = inlined_call_operand.vmem [shape: f32[16,32], index: 0, kind: input, shape index: {}]   ;;  %s383_s3 = inlined_call_operand.vmem [shape: bf16[64,32], index: 3, kind: input, shape index: {}]   ;;  %s384_s2 = inlined_call_operand.vmem [shape: f32[1,64], index: 2, kind: input, shape index: {}]   ;;  %s385_s4 = inlined_call_operand.vmem [shape: f32[1,32], index: 4, kind: input, shape index: {}]   ;;  %s386_s5 = inlined_call_operand.vmem [shape: f32[1,32], index: 5, kind: input, shape index: {}]   ;;  %s387_s6 = inlined_call_operand.vmem [shape: f32[1,32], index: 6, kind: input, shape index: {}]   ;;  %s388_s7 = inlined_call_operand.vmem [shape: f32[16,32], index: 7, kind: output, shape index: {}]  }
   0x1   :  { %258 = vmatprep.subr.bf16.mxu0 %v290_v0  ;;  %v280_v1 = vld [vmem:[%s381_s1] sm:$0xff]   ;;  %262 = vmatprep.mubr.msk.bf16.mxu0 %vm291_vm0, %v290_v0  ;;  %v281_v2 = vld [vmem:[%s381_s1 + $0x8] sm:$0xff]   ;;  %v284_v8 = vld [vmem:[%s383_s3 + $0x10] sm:$0xff]  }
   0x2   :  { %266 = vmatprep.subr.bf16.mxu1 %v290_v0  ;;  %274 = vmatprep.mubr.msk.bf16.mxu1 %vm291_vm0, %v290_v0  ;;  %v27_v3 = vld [vmem:[%s382_s0] sm:$0xff]  ;;  %v28_v4 = vld [vmem:[%s382_s0 + $0x8] sm:$0xff]  ;;  %v285_v9 = vld [vmem:[%s383_s3 + $0x18] sm:$0xff]  }
   0x3   :  { %259 = vmatpush3.bf16.msra.mxu0 %v280_v1  ;;  %v282_v5 = vld [vmem:[%s383_s3] sm:$0xff]   ;;  %v283_v6 = vld [vmem:[%s383_s3 + $0x8] sm:$0xff]   ;;  %v29_v7 = vpack.c.bf16 %v28_v4, %v27_v3 }
   0x4   :  { %260 = vmatprep.subr.bf16.mxu0 %v290_v0  ;;  %267 = vmatpush3.bf16.msra.mxu1 %v282_v5  ;;  %v238_v10 = vld [vmem:[%s384_s2] ss:$0 sm:$0xff] }
   0x5   :  { %268 = vmatprep.subr.bf16.mxu1 %v290_v0  ;;  %v242_v20 = vld [vmem:[%s385_s4] ss:$0 sm:$0xff] }
   0x6   :  { %v248_v48 = vld [vmem:[%s386_s5] ss:$0 sm:$0xff] }
   0x7   :  { %261 = vmatpush3.bf16.msra.mxu0 %v281_v2  ;;  %v249_v50 = vld [vmem:[%s387_s6] ss:$0 sm:$0xff] }
   0x8   :  { %269 = vmatpush3.bf16.msra.mxu1 %v283_v6 }
   0x9   :  { %270 = vmatprep.subr.bf16.mxu1 %v290_v0 }
   0xa   :  { %263 = vmatmul.mubr.msk.bf16.vlgmr.msra.gmra.mrb[0].mxu0 %vm53_vm1, %v29_v7 }
   0xc   :  { %271 = vmatpush3.bf16.msra.mxu1 %v284_v8 }
   0xd   :  { %272 = vmatprep.subr.bf16.mxu1 %v290_v0 }
  0x10   :  { %273 = vmatpush3.bf16.msra.mxu1 %v285_v9 }
  0xdd   :  { %v91_v11 = vpop.f32.mrb[0].mxu0 }
  0xde   :  { %v92_v12 = vadd.f32 %v238_v10, %v91_v11  ;;  %v264_v13 = vpop.f32.mrb[1].mxu0 }
  0xdf   :  { %v94_v14 = vpop.f32.mrb[2].mxu0 }
  0xe0   :  { %v95_v15 = vadd.f32 %v238_v10, %v94_v14  ;;  %v265_v16 = vpop.f32.mrb[3].mxu0  ;;  %v98_v17 = vmax.f32 %v92_v12, 0.0 }
  0xe2   :  { %v99_v18 = vmax.f32 %v95_v15, 0.0 }
  0xe4   :  { %v100_v19 = vpack.c.bf16 %v99_v18, %v98_v17 }
  0xe6   :  { %275 = vmatmul.mubr.msk.bf16.vlgmr.msra.gmra.mrb[0].mxu1 %vm140_vm2, %v100_v19 }
 0x1b9   :  { %v178_v21 = vpop.f32.mrb[0].mxu1 }
 0x1ba   :  { %v179_v22 = vadd.f32 %v242_v20, %v178_v21  ;;  %v276_v23 = vpop.f32.mrb[1].mxu1 }
 0x1bb   :  { %v181_v24 = vpop.f32.mrb[2].mxu1 }
 0x1bc   :  { %v182_v25 = vadd.f32 %v242_v20, %v181_v24  ;;  %v277_v26 = vpop.f32.mrb[3].mxu1  ;;  %v185_v27 = vadd.f32 %v179_v22, %v27_v3 }
 0x1be   :  { %v187_v28 = vsel %vm53_vm1, %v185_v27, 0.0  ;;  %v186_v29 = vadd.f32 %v182_v25, %v28_v4 }
 0x1bf   :  { %188 = vadd.xlane.f32.xlu0 %v187_v28 }
 0x1c0   :  { %v190_v30 = vsel %vm53_vm1, %v186_v29, 0.0 }
 0x1c3   :  { %191 = vadd.xlane.f32.xlu0 %v190_v30 }
 0x24c   :  { %v189_v31 = vpop.xlane.xlu0 %188 }
 0x24d   :  { %v194_v32 = vmul.f32 0.03125, %v189_v31 }
 0x24f   :  { %v196_v33 = vsub.f32 %v185_v27, %v194_v32 }
 0x250   :  { %v192_v34 = vpop.xlane.xlu0 %191 }
 0x251   :  { %v195_v35 = vmul.f32 0.03125, %v192_v34  ;;  %v198_v36 = vmul.f32 %v196_v33, %v196_v33 }
 0x253   :  { %v197_v37 = vsub.f32 %v186_v29, %v195_v35  ;;  %v200_v38 = vsel %vm53_vm1, %v198_v36, 0.0 }
 0x254   :  { %201 = vadd.xlane.f32.xlu1 %v200_v38 }
 0x255   :  { %v199_v39 = vmul.f32 %v197_v37, %v197_v37 }
 0x257   :  { %v203_v40 = vsel %vm53_vm1, %v199_v39, 0.0 }
 0x258   :  { %204 = vadd.xlane.f32.xlu1 %v203_v40 }
 0x2e1   :  { %v202_v41 = vpop.xlane.xlu1 %201 }
 0x2e2   :  { %v206_v42 = vmul.f32 0.03125, %v202_v41 }
 0x2e4   :  { %v208_v43 = vadd.f32 1e-05, %v206_v42 }
 0x2e5   :  { %v205_v44 = vpop.xlane.xlu1 %204 }
 0x2e6   :  { %286 = vrsqrt.f32 %v208_v43  ;;  %v207_v45 = vmul.f32 0.03125, %v205_v44 }
 0x2e8   :  { %v209_v46 = vadd.f32 1e-05, %v207_v45 }
 0x2ea   :  { %288 = vrsqrt.f32 %v209_v46 }
 0x2f0   :  { %v287_v47 = vpop.eup %286 }
 0x2f1   :  { %v212_v49 = vmul.f32 %v287_v47, %v196_v33 }
 0x2f3   :  { %v221_v51 = vmul.f32 %v248_v48, %v212_v49 }
 0x2f4   :  { %v289_v52 = vpop.eup %288 }
 0x2f5   :  { %v230_v53 = vadd.f32 %v249_v50, %v221_v51  ;;  %v213_v54 = vmul.f32 %v289_v52, %v197_v37 }
 0x2f7   :  { %232 = vst.msk [vmem:[%s388_s7] sm:$0xff] %vm53_vm1, %v230_v53  ;;  %v222_v55 = vmul.f32 %v248_v48, %v213_v54 }
 0x2f9   :  { %v231_v56 = vadd.f32 %v249_v50, %v222_v55 }
 0x2fb   :  { %233 = vst.msk [vmem:[%s388_s7 + $0x8] sm:$0xff] %vm53_vm1, %v231_v56 }

// kernel: early_encoder_forward.13
= control target key start
LH: loop header
LB: loop body
LE: loop exit
PB: predicated region body
PF: predicated region fallthrough
CT: control target
= control target key end

     0   :  { %s1232_s21 = smov 0   ;;  %s1368_s0 = inlined_call_operand.vmem [shape: bf16[2,8,96], index: 0, kind: input, shape index: {}]   ;;  %s1369_s1 = inlined_call_operand.vmem [shape: f32[2,8,32], index: 1, kind: input, shape index: {}]   ;;  %s1370_s2 = inlined_call_operand.vmem [shape: bf16[32,32], index: 2, kind: input, shape index: {}]   ;;  %s1371_s3 = inlined_call_operand.vmem [shape: f32[1,32], index: 3, kind: input, shape index: {}]   ;;  %s1372_s4 = inlined_call_operand.vmem [shape: f32[1,32], index: 4, kind: input, shape index: {}]   ;;  %s1373_s5 = inlined_call_operand.vmem [shape: f32[1,32], index: 5, kind: input, shape index: {}]   ;;  %s1374_s6 = inlined_call_operand.vmem [shape: f32[2,8,32], index: 6, kind: output, shape index: {}]  }
   0x1 LB: > { %s1014_s22 = sadd.s32 4294967295, %s1182_s21   ;;  %p1018_p0 = scmp.ge.s32.totalorder %s1182_s21, 1  ;;  %s1182_s21 = sphi %s1232_s21, %s16_s21  }
   0x2   : > { %p220_p1 = scmp.lt.s32.totalorder %s1182_s21, 3 }
   0x4   : > { %p221_p2 = pnand %p1018_p0, %p220_p1 }
   0x5   : > { %p252_p3 = scmp.lt.s32.totalorder (!%p221_p2), %s1014_s22, 1  ;;  %v1184_v0 = vmov (!%p221_p2), 0.0   ;;  %vm1185_vm0 = vmmov (!%p221_p2), 0   ;;  %s1186_s27 = smov (!%p221_p2), 96   ;;  %vm271_vm1 = vcmask (!%p221_p2), 64512   ;;  %vm336_vm2 = vcmask (!%p221_p2), 1043456  }
   0x6   : > { %224 = sbr.rel (%p221_p2) target bundleno = 3246 (0xcae), region = 44  ;;  %1064 = vmatprep.subr.bf16.mxu0 (!%p221_p2), %v1184_v0  ;;  %1066 = vmatprep.mubr.msk.bf16.mxu0 (!%p221_p2), %vm1185_vm0, %v1184_v0  ;;  %s1187_s28 = smov (!%p221_p2), 64   ;;  %v494_v40 = vld [vmem:[%s1370_s2 + $0x4] sm:$0xf] (!%p221_p2)  ;;  %v381_v46 = vld [vmem:[%s1370_s2] sm:$0xf] (!%p221_p2) }
   0x7   : > { %1070 = vmatprep.subr.bf16.mxu1 (!%p221_p2), %v1184_v0  ;;  %1072 = vmatprep.mubr.msk.bf16.mxu1 (!%p221_p2), %vm1185_vm0, %v1184_v0  ;;  %s1188_s29 = smov (!%p221_p2), 88   ;;  %s1189_s30 = smov (!%p221_p2), 120   ;;  %v499_v41 = vsel (!%p221_p2), %vm336_vm2, %v494_v40, 0  ;;  %v545_v49 = vsel (!%p221_p2), %vm336_vm2, %v381_v46, 0  ;;  %vm917_vm3 = vcmask (!%p221_p2), 261120  }
   0x8   : > { %s1190_s7 = smov (!%p221_p2), 56   ;;  %s1191_s10 = smov (!%p221_p2), 80  }
   0x9   : > { %s1192_s11 = smov (!%p221_p2), 112   ;;  %s1193_s14 = smov (!%p221_p2), 48  }
   0xa   : > { %s1194_s15 = smov (!%p221_p2), 72   ;;  %s1195_s16 = smov (!%p221_p2), 104  }
   0xb   : > { %s1196_s19 = smov (!%p221_p2), 40  }
   0xd   : > { %s1376_s22 = smov (!%p252_p3, %s1014_s22), 1 }
   0xe   : > { %s1019_s23 = sshll.u32 %s1376_s22, 2  ;;  %s1020_s24 = sshll.u32 %s1376_s22, 3 }
   0xf   : > { %s255_s26 = scalar_lea.vmem %s1368_s0, %s1019_s23  ;;  %s263_s12 = scalar_lea.vmem %s1374_s6, %s1020_s24 }
  0x10   : > { %v265_v1 = vld [vmem:[%s255_s26] sm:$0xf] }
  0x11   : > { %v1252_v2 = vcombine.low %v265_v1, %v265_v1 }
  0x13   : > { %269 = vrot.lane.b32.xlu0 %v1252_v2, %s1186_s27  ;;  %331 = vrot.lane.b32.xlu1 %v1252_v2, %s1187_s28  ;;  %s259_s27 = scalar_lea.vmem %s1369_s1, %s1020_s24 }
  0x85   : > { %v270_v3 = vpop.permute.xlu0 %269  ;;  %v332_v11 = vpop.permute.xlu1 %331 }
  0x86   : > { %v276_v4 = vsel %vm271_vm1, %v270_v3, 0  ;;  %v338_v12 = vsel %vm336_vm2, %v332_v11, 0 }
  0x87   : > { %1065 = vmatpush3.bf16.xpose.msra.mxu0 %v276_v4  ;;  %1071 = vmatpush3.bf16.msra.mxu1 %v338_v12 }
  0x88   : > { %1082 = vmatprep.subr.bf16.mxu0 %v1184_v0  ;;  %1076 = vmatprep.subr.bf16.mxu1 %v1184_v0 }
  0x8e   : > { %1067 = vmatmul.mubr.msk.bf16.vlgmr.msra.gmra.mrb[0].mxu0 %vm271_vm1, %v265_v1 }
  0x8f   : > { %1084 = vmatprep.mubr.msk.bf16.mxu0 %vm1185_vm0, %v1184_v0 }
 0x161   : > { %v312_v5 = vpop.f32.mrb[0].mxu0 }
 0x162   : > { %v318_v6 = vmul.f32 0.35355338, %v312_v5  ;;  %v1068_v7 = vpop.f32.mrb[1].mxu0 }
 0x163   : > { %v315_v8 = vpop.f32.mrb[2].mxu0 }
 0x164   : > { %v1069_v9 = vpop.f32.mrb[3].mxu0  ;;  %v319_v10 = vsel %vm271_vm1, %v318_v6, -inf }
 0x165   : > { %320 = vmax.xlane.f32.xlu0 %v319_v10 }
 0x1f2   : > { %v321_v13 = vpop.xlane.xlu0 %320 }
 0x1f3   : > { %v322_v14 = vsub.f32 %v318_v6, %v321_v13 }
 0x1f5   : > { %v323_v15 = vmul.f32 1.442695, %v322_v14 }
 0x1f7   : > { %1158 = vpow2.f32 %v323_v15 }
 0x201   : > { %v1159_v16 = vpop.eup %1158 }
 0x202   : > { %v325_v17 = vsel %vm271_vm1, %v1159_v16, 0.0 }
 0x203   : > { %326 = vadd.xlane.f32.xlu1 %v325_v17 }
 0x214   : > { %384 = vrot.lane.b32.xlu1 %v1252_v2, %s1188_s29 }
 0x218   : > { %382 = vrot.lane.b32.xlu1 %v1252_v2, %s1189_s30 }
 0x290   : > { %v327_v18 = vpop.xlane.xlu1 %326 }
 0x291   : > { %1160 = vrcp.f32 %v327_v18 }
 0x294   : > { %v385_v20 = vpop.permute.xlu1 %384 }
 0x295   : > { %v390_v22 = vsel %vm271_vm1, %v385_v20, 0 }
 0x298   : > { %v383_v24 = vpop.permute.xlu1 %382 }
 0x29b   : > { %v1161_v19 = vpop.eup %1160 }
 0x29c   : > { %v329_v21 = vmul.f32 %v1161_v19, %v1159_v16 }
 0x29e   : > { %v330_v23 = vpack.c.bf16 %v329_v21, %v329_v21 }
 0x2a0   : > { %1073 = vmatmul.mubr.msk.bf16.vlgmr.msra.gmra.mrb[0].mxu1 %vm271_vm1, %v330_v23 }
 0x2a1   : > { %1077 = vmatpush3.bf16.xpose.msra.mxu1 %v390_v22  ;;  %1078 = vmatprep.mubr.msk.bf16.mxu1 %vm1185_vm0, %v1184_v0 }
 0x2a2   : > { %1088 = vmatprep.subr.bf16.mxu1 %v1184_v0 }
 0x2a8   : > { %1079 = vmatmul.mubr.msk.bf16.vlgmr.msra.gmra.mrb[4].mxu1 %vm271_vm1, %v383_v24 }
 0x2a9   : > { %1090 = vmatprep.mubr.msk.bf16.mxu1 %vm1185_vm0, %v1184_v0  ;;  %1089 = vmatpush3.bf16.msra.mxu1 %v499_v41 }
 0x2aa   : > { %1100 = vmatprep.subr.bf16.mxu1 %v1184_v0 }
 0x373   : > { %v374_v25 = vpop.f32.mrb[0].mxu1 }
 0x374   : > { %v1074_v26 = vpop.f32.mrb[1].mxu1  ;;  %v380_v50 = vpack.c.bf16 %v374_v25, %v374_v25 }
 0x375   : > { %v377_v27 = vpop.f32.mrb[2].mxu1  ;;  %v699_v26 = vld [vmem:[%s1370_s2 + $0x8] sm:$0xf] }
 0x376   : > { %v1075_v28 = vpop.f32.mrb[3].mxu1  ;;  %v704_v27 = vsel %vm336_vm2, %v699_v26, 0 }
 0x37b   : > { %v426_v29 = vpop.f32.mrb[4].mxu1 }
 0x37c   : > { %v432_v30 = vmul.f32 0.35355338, %v426_v29  ;;  %v1080_v31 = vpop.f32.mrb[5].mxu1 }
 0x37d   : > { %v429_v32 = vpop.f32.mrb[6].mxu1 }
 0x37e   : > { %v1081_v33 = vpop.f32.mrb[7].mxu1  ;;  %v433_v34 = vsel %vm271_vm1, %v432_v30, -inf }
 0x37f   : > { %434 = vmax.xlane.f32.xlu1 %v433_v34 }
 0x40c   : > { %v435_v35 = vpop.xlane.xlu1 %434 }
 0x40d   : > { %v436_v36 = vsub.f32 %v432_v30, %v435_v35 }
 0x40f   : > { %v437_v37 = vmul.f32 1.442695, %v436_v36 }
 0x411   : > { %1162 = vpow2.f32 %v437_v37 }
 0x41b   : > { %v1163_v38 = vpop.eup %1162 }
 0x41c   : > { %v439_v39 = vsel %vm271_vm1, %v1163_v38, 0.0 }
 0x41d   : > { %440 = vadd.xlane.f32.xlu0 %v439_v39 }
 0x433   : > { %445 = vrot.lane.b32.xlu0 %v1252_v2, %s1190_s7 }
 0x437   : > { %589 = vrot.lane.b32.xlu0 %v1252_v2, %s1191_s10 }
 0x43b   : > { %587 = vrot.lane.b32.xlu0 %v1252_v2, %s1192_s11 }
 0x4aa   : > { %v441_v42 = vpop.xlane.xlu0 %440 }
 0x4ab   : > { %1164 = vrcp.f32 %v441_v42 }
 0x4ae   : > { %v446_v43 = vpop.permute.xlu0 %445 }
 0x4af   : > { %v451_v44 = vsel %vm336_vm2, %v446_v43, 0 }
 0x4b0   : > { %1083 = vmatpush3.bf16.msra.mxu0 %v451_v44 }
 0x4b1   : > { %1094 = vmatprep.subr.bf16.mxu0 %v1184_v0 }
 0x4b2   : > { %v590_v51 = vpop.permute.xlu0 %589 }
 0x4b3   : > { %v595_v54 = vsel %vm271_vm1, %v590_v51, 0 }
 0x4b5   : > { %v1165_v45 = vpop.eup %1164 }
 0x4b6   : > { %v443_v47 = vmul.f32 %v1165_v45, %v1163_v38  ;;  %v588_v59 = vpop.permute.xlu0 %587 }
 0x4b8   : > { %v444_v48 = vpack.c.bf16 %v443_v47, %v443_v47 }
 0x4ba   : > { %1085 = vmatmul.mubr.msk.bf16.vlgmr.msra.gmra.mrb[4].mxu0 %vm271_vm1, %v444_v48 }
 0x4bb   : > { %1095 = vmatpush3.bf16.msra.mxu0 %v545_v49  ;;  %1096 = vmatprep.mubr.msk.bf16.mxu0 %vm1185_vm0, %v1184_v0 }
 0x4bc   : > { %1106 = vmatprep.subr.bf16.mxu0 %v1184_v0 }
 0x4c2   : > { %1097 = vmatmul.mubr.msk.bf16.vlgmr.msra.gmra.mrb[8].mxu0 %vm271_vm1, %v380_v50 }
 0x4c3   : > { %1108 = vmatprep.mubr.msk.bf16.mxu0 %vm1185_vm0, %v1184_v0 }
 0x58d   : > { %v487_v52 = vpop.f32.mrb[4].mxu0 }
 0x58e   : > { %v493_v53 = vpack.c.bf16 %v487_v52, %v487_v52  ;;  %v1086_v55 = vpop.f32.mrb[5].mxu0 }
 0x58f   : > { %v490_v56 = vpop.f32.mrb[6].mxu0 }
 0x590   : > { %v1087_v57 = vpop.f32.mrb[7].mxu0  ;;  %1091 = vmatmul.mubr.msk.bf16.vlgmr.msra.gmra.mrb[8].mxu1 %vm271_vm1, %v493_v53 }
 0x591   : > { %1101 = vmatpush3.bf16.xpose.msra.mxu1 %v595_v54  ;;  %1102 = vmatprep.mubr.msk.bf16.mxu1 %vm1185_vm0, %v1184_v0 }
 0x592   : > { %1112 = vmatprep.subr.bf16.mxu1 %v1184_v0 }
 0x595   : > { %v581_v58 = vpop.f32.mrb[8].mxu0 }
 0x596   : > { %v1098_v60 = vpop.f32.mrb[9].mxu0 }
 0x597   : > { %v584_v61 = vpop.f32.mrb[10].mxu0 }
 0x598   : > { %v1099_v62 = vpop.f32.mrb[11].mxu0  ;;  %1103 = vmatmul.mubr.msk.bf16.vlgmr.msra.gmra.mrb[12].mxu1 %vm271_vm1, %v588_v59  ;;  %v1035_v61 = vld [vmem:[%s1371_s3] ss:$0 sm:$0xff] }
 0x599   : > { %1114 = vmatprep.mubr.msk.bf16.mxu1 %vm1185_vm0, %v1184_v0  ;;  %1113 = vmatpush3.bf16.msra.mxu1 %v704_v27 }
 0x59a   : > { %1124 = vmatprep.subr.bf16.mxu1 %v1184_v0 }
 0x663   : > { %v535_v63 = vpop.f32.mrb[8].mxu1 }
 0x664   : > { %v1306_v1 = vadd.f32 %v581_v58, %v535_v63  ;;  %v1092_v3 = vpop.f32.mrb[9].mxu1 }
 0x665   : > { %v538_v4 = vpop.f32.mrb[10].mxu1  ;;  %v915_v3 = vld [vmem:[%s259_s27] sm:$0xff] }
 0x666   : > { %v1093_v5 = vpop.f32.mrb[11].mxu1 }
 0x66b   : > { %v631_v6 = vpop.f32.mrb[12].mxu1 }
 0x66c   : > { %v637_v7 = vmul.f32 0.35355338, %v631_v6  ;;  %v1104_v8 = vpop.f32.mrb[13].mxu1 }
 0x66d   : > { %v634_v9 = vpop.f32.mrb[14].mxu1 }
 0x66e   : > { %v1105_v10 = vpop.f32.mrb[15].mxu1  ;;  %v638_v11 = vsel %vm271_vm1, %v637_v7, -inf }
 0x66f   : > { %639 = vmax.xlane.f32.xlu1 %v638_v11 }
 0x680   : > { %650 = vrot.lane.b32.xlu1 %v1252_v2, %s1193_s14 }
 0x684   : > { %749 = vrot.lane.b32.xlu1 %v1252_v2, %s1194_s15 }
 0x688   : > { %747 = vrot.lane.b32.xlu1 %v1252_v2, %s1195_s16 }
 0x6fc   : > { %v640_v12 = vpop.xlane.xlu1 %639 }
 0x6fd   : > { %v641_v13 = vsub.f32 %v637_v7, %v640_v12 }
 0x6ff   : > { %v642_v14 = vmul.f32 1.442695, %v641_v13 }
 0x700   : > { %v651_v17 = vpop.permute.xlu1 %650 }
 0x701   : > { %1166 = vpow2.f32 %v642_v14  ;;  %v656_v18 = vsel %vm336_vm2, %v651_v17, 0  ;;  %v1036_v17 = vld [vmem:[%s1372_s4] ss:$0 sm:$0xff] }
 0x702   : > { %1107 = vmatpush3.bf16.msra.mxu0 %v656_v18 }
 0x703   : > { %1118 = vmatprep.subr.bf16.mxu0 %v1184_v0 }
 0x704   : > { %v750_v21 = vpop.permute.xlu1 %749 }
 0x705   : > { %v755_v23 = vsel %vm271_vm1, %v750_v21, 0 }
 0x708   : > { %v748_v25 = vpop.permute.xlu1 %747 }
 0x70b   : > { %v1167_v15 = vpop.eup %1166 }
 0x70c   : > { %v644_v16 = vsel %vm271_vm1, %v1167_v15, 0.0 }
 0x70d   : > { %645 = vadd.xlane.f32.xlu0 %v644_v16 }
 0x79a   : > { %v646_v19 = vpop.xlane.xlu0 %645 }
 0x79b   : > { %1168 = vrcp.f32 %v646_v19  ;;  %v1037_v19 = vld [vmem:[%s1373_s5] ss:$0 sm:$0xff] }
 0x7a5   : > { %v1169_v20 = vpop.eup %1168 }
 0x7a6   : > { %v648_v22 = vmul.f32 %v1169_v20, %v1167_v15 }
 0x7a8   : > { %v649_v24 = vpack.c.bf16 %v648_v22, %v648_v22 }
 0x7aa   : > { %1109 = vmatmul.mubr.msk.bf16.vlgmr.msra.gmra.mrb[12].mxu0 %vm271_vm1, %v649_v24 }
 0x7ab   : > { %1119 = vmatpush3.bf16.xpose.msra.mxu0 %v755_v23  ;;  %1120 = vmatprep.mubr.msk.bf16.mxu0 %vm1185_vm0, %v1184_v0 }
 0x7ac   : > { %1130 = vmatprep.subr.bf16.mxu0 %v1184_v0 }
 0x7b2   : > { %1121 = vmatmul.mubr.msk.bf16.vlgmr.msra.gmra.mrb[16].mxu0 %vm271_vm1, %v748_v25 }
 0x7b3   : > { %1132 = vmatprep.mubr.msk.bf16.mxu0 %vm1185_vm0, %v1184_v0 }
 0x87d   : > { %v692_v28 = vpop.f32.mrb[12].mxu0 }
 0x87e   : > { %v698_v29 = vpack.c.bf16 %v692_v28, %v692_v28  ;;  %v1110_v30 = vpop.f32.mrb[13].mxu0 }
 0x87f   : > { %v695_v31 = vpop.f32.mrb[14].mxu0 }
 0x880   : > { %v1111_v32 = vpop.f32.mrb[15].mxu0  ;;  %1115 = vmatmul.mubr.msk.bf16.vlgmr.msra.gmra.mrb[16].mxu1 %vm271_vm1, %v698_v29 }
 0x881   : > { %1126 = vmatprep.mubr.msk.bf16.mxu1 %vm1185_vm0, %v1184_v0  ;;  %v859_v0 = vld [vmem:[%s1370_s2 + $0xc] sm:$0xf] }
 0x882   : > { %v864_v44 = vsel %vm336_vm2, %v859_v0, 0 }
 0x883   : > { %1131 = vmatpush3.bf16.msra.mxu0 %v864_v44 }
 0x885   : > { %v791_v33 = vpop.f32.mrb[16].mxu0 }
 0x886   : > { %v797_v34 = vmul.f32 0.35355338, %v791_v33  ;;  %v1122_v35 = vpop.f32.mrb[17].mxu0 }
 0x887   : > { %v794_v36 = vpop.f32.mrb[18].mxu0 }
 0x888   : > { %v1123_v37 = vpop.f32.mrb[19].mxu0  ;;  %v798_v38 = vsel %vm271_vm1, %v797_v34, -inf }
 0x889   : > { %799 = vmax.xlane.f32.xlu1 %v798_v38 }
 0x916   : > { %v800_v39 = vpop.xlane.xlu1 %799 }
 0x917   : > { %v801_v40 = vsub.f32 %v797_v34, %v800_v39 }
 0x919   : > { %v802_v41 = vmul.f32 1.442695, %v801_v40 }
 0x91b   : > { %1170 = vpow2.f32 %v802_v41 }
 0x925   : > { %v1171_v42 = vpop.eup %1170 }
 0x926   : > { %v804_v43 = vsel %vm271_vm1, %v1171_v42, 0.0 }
 0x927   : > { %805 = vadd.xlane.f32.xlu0 %v804_v43 }
 0x93d   : > { %810 = vrot.lane.b32.xlu0 %v1252_v2, %s1196_s19 }
 0x953   : > { %v740_v45 = vpop.f32.mrb[16].mxu1 }
 0x954   : > { %v746_v46 = vadd.f32 %v740_v45, %v1306_v1  ;;  %v1116_v47 = vpop.f32.mrb[17].mxu1 }
 0x955   : > { %v743_v48 = vpop.f32.mrb[18].mxu1 }
 0x956   : > { %v1117_v49 = vpop.f32.mrb[19].mxu1 }
 0x9b4   : > { %v806_v50 = vpop.xlane.xlu0 %805 }
 0x9b5   : > { %1172 = vrcp.f32 %v806_v50 }
 0x9b8   : > { %v811_v51 = vpop.permute.xlu0 %810 }
 0x9b9   : > { %v816_v2 = vsel %vm336_vm2, %v811_v51, 0 }
 0x9ba   : > { %1125 = vmatpush3.bf16.msra.mxu1 %v816_v2 }
 0x9bf   : > { %v1173_v52 = vpop.eup %1172 }
 0x9c0   : > { %v808_v53 = vmul.f32 %v1173_v52, %v1171_v42 }
 0x9c2   : > { %v809_v54 = vpack.c.bf16 %v808_v53, %v808_v53 }
 0x9c4   : > { %1127 = vmatmul.mubr.msk.bf16.vlgmr.msra.gmra.mrb[20].mxu1 %vm271_vm1, %v809_v54 }
 0xa97   : > { %v852_v55 = vpop.f32.mrb[20].mxu1 }
 0xa98   : > { %v858_v56 = vpack.c.bf16 %v852_v55, %v852_v55  ;;  %v1128_v57 = vpop.f32.mrb[21].mxu1 }
 0xa99   : > { %v855_v58 = vpop.f32.mrb[22].mxu1 }
 0xa9a   : > { %v1129_v59 = vpop.f32.mrb[23].mxu1  ;;  %1133 = vmatmul.mubr.msk.bf16.vlgmr.msra.gmra.mrb[20].mxu0 %vm271_vm1, %v858_v56 }
 0xb6d   : > { %v900_v60 = vpop.f32.mrb[20].mxu0 }
 0xb6e   : > { %v906_v62 = vadd.f32 %v900_v60, %v746_v46  ;;  %v1134_v63 = vpop.f32.mrb[21].mxu0 }
 0xb6f   : > { %v903_v1 = vpop.f32.mrb[22].mxu0 }
 0xb70   : > { %v914_v4 = vadd.f32 %v1035_v61, %v906_v62  ;;  %v1135_v5 = vpop.f32.mrb[23].mxu0 }
 0xb72   : > { %v916_v6 = vadd.f32 %v915_v3, %v914_v4 }
 0xb74   : > { %v918_v7 = vsel %vm917_vm3, %v916_v6, 0.0 }
 0xb75   : > { %919 = vadd.xlane.f32.xlu0 %v918_v7 }
 0xc02   : > { %v920_v8 = vpop.xlane.xlu0 %919 }
 0xc03   : > { %v922_v9 = vmul.f32 0.03125, %v920_v8 }
 0xc05   : > { %v923_v10 = vsub.f32 %v916_v6, %v922_v9 }
 0xc07   : > { %v924_v11 = vmul.f32 %v923_v10, %v923_v10 }
 0xc09   : > { %v925_v12 = vsel %vm917_vm3, %v924_v11, 0.0 }
 0xc0a   : > { %926 = vadd.xlane.f32.xlu1 %v925_v12 }
 0xc97   : > { %v927_v13 = vpop.xlane.xlu1 %926 }
 0xc98   : > { %v928_v14 = vmul.f32 0.03125, %v927_v13 }
 0xc9a   : > { %v929_v15 = vadd.f32 1e-05, %v928_v14 }
 0xc9c   : > { %1174 = vrsqrt.f32 %v929_v15 }
 0xca6   : > { %v1175_v16 = vpop.eup %1174 }
 0xca7   : > { %v931_v18 = vmul.f32 %v1175_v16, %v923_v10 }
 0xca9   : > { %v939_v20 = vmul.f32 %v1036_v17, %v931_v18 }
 0xcab   : > { %v947_v21 = vadd.f32 %v1037_v19, %v939_v20 }
 0xcad   : > { %948 = vst.msk [vmem:[%s263_s12] sm:$0xff] %vm917_vm3, %v947_v21 }
 0xcae PF: > { %s16_s21 = sadd.s32 1, %s1182_s21  }
 0xcaf   : > { %p13_p4 = scmp.ge.s32.totalorder %s16_s21, 4  }
 0xcb1   :  { %15 = sbr.rel (!%p13_p4) target bundleno = 1 (0x1), region = 77 }

</bundles_post_ra>
